<compile_context>
chip_gen: v7x
topology: tpu7x:2x2x1
jax: 0.10.0
libtpu: 0.0.40
codegen_flags: <defaults>
</compile_context>

<pallas_src>
import functools
import math

import jax
import jax.numpy as jnp
import numpy as np
from jax.experimental import pallas as pl
from jax.experimental.pallas import tpu as pltpu


def _round_up(x, m):
    return ((x + m - 1) // m) * m


def _vmem_limit_bytes():
    """Generation-aware scoped-VMEM budget (~3/4 of physical per-core VMEM:
    ~96 MiB on v5e/v6e, ~48 MiB on v7x); conservative fallback if the query
    is unavailable."""
    try:
        phys = int(pltpu.get_tpu_info().vmem_capacity_bytes)
    except Exception:
        phys = 64 * 1024 * 1024          # v7x-safe default
    return max(32 * 1024 * 1024, (phys // 4) * 3)


def _mosaic_params(vmem_limit):
    return pltpu.CompilerParams(
        dimension_semantics=("parallel",),
        vmem_limit_bytes=int(vmem_limit),
    )


def _pick_row_tile(n_rows, max_tile=256):
    """Largest row tile <= max_tile that evenly divides n_rows (or n_rows)."""
    if n_rows <= max_tile:
        return n_rows
    for cand in (256, 128, 64, 32, 16, 8):
        if cand <= max_tile and n_rows % cand == 0:
            return cand
    return n_rows


def _fold_conv_weight(w, s):
    """torch (OC, C, kh, kw) conv weight -> (kh_eff*kw_eff*s*s*C, OC) for the
    stride-1 space-to-depth formulation (zero rows where k % s != 0).  Row
    order is (qh, qw, rh, rw, c), matching the in-kernel im2col column order
    and the wrapper-side input fold."""
    oc, c, kh, kw = w.shape
    kh_eff = -(-kh // s)
    kw_eff = -(-kw // s)
    wp = jnp.zeros((oc, c, kh_eff * s, kw_eff * s), w.dtype)
    wp = wp.at[:, :, :kh, :kw].set(w)
    wp = wp.reshape(oc, c, kh_eff, s, kw_eff, s)
    wp = jnp.transpose(wp, (2, 4, 3, 5, 1, 0))      # (qh, qw, rh, rw, c, oc)
    return wp.reshape(kh_eff * kw_eff * s * s * c, oc)


def _fold_input_nhwc(h, layer):
    """Space-to-depth fold (XLA, one permute) of an NHWC activation for a
    stride-s conv, plus right-padding of the width so every in-kernel tap
    window is in bounds.  Zero-padded positions only ever meet zero weight
    rows or feed discarded (garbage) output columns."""
    n = h.shape[0]
    s = layer["s"]
    if s > 1:
        th, tw = layer["ph"] * s, layer["pw"] * s
        h = h[:, :min(h.shape[1], th), :min(h.shape[2], tw), :]
        dh, dw = th - h.shape[1], tw - h.shape[2]
        if dh or dw:
            h = jnp.pad(h, ((0, 0), (0, dh), (0, dw), (0, 0)))
        c = h.shape[3]
        h = h.reshape(n, layer["ph"], s, layer["pw"], s, c)
        h = h.transpose(0, 1, 3, 2, 4, 5).reshape(
            n, layer["ph"], layer["pw"], s * s * c)
    if h.shape[2] < layer["in_w"]:
        h = jnp.pad(h, ((0, 0), (0, 0), (0, layer["in_w"] - h.shape[2]), (0, 0)))
    return h


# ---------------------------------------------------------------------------
# Pallas kernels
# ---------------------------------------------------------------------------
def _conv_segment_kernel(*refs, meta, bn):
    """Fused stack of VALID convs (+ReLU) on one batch tile.

    refs = (x, w_0, b_0, ..., w_{L-1}, b_{L-1}, out, col_scratch, act_0, ...).
    Per conv: all kh_eff*kw_eff taps are packed into the shared im2col scratch
    (K = taps * cin) and contracted with a single MXU matmul (fp32 accumulate);
    intermediate activations stay in VMEM scratch and never touch HBM.
    """
    n_l = len(meta)
    x_ref = refs[0]
    w_refs = [refs[1 + 2 * i] for i in range(n_l)]
    b_refs = [refs[2 + 2 * i] for i in range(n_l)]
    o_ref = refs[1 + 2 * n_l]
    col_ref = refs[2 + 2 * n_l]
    act_refs = list(refs[3 + 2 * n_l:])

    inp_ref = x_ref
    for li, L in enumerate(meta):
        oh, ow8, cin, oc = L["oh"], L["ow8"], L["cin"], L["oc"]
        khe, kwe = L["khe"], L["kwe"]
        m = bn * oh * ow8
        k = khe * kwe * cin
        t = 0
        for qh in range(khe):
            for qw in range(kwe):
                sub = inp_ref[:, qh:qh + oh, qw:qw + ow8, :]   # contiguous tap
                col_ref[0:m, t * cin:(t + 1) * cin] = sub.reshape(m, cin)
                t += 1
        acc = jnp.dot(col_ref[0:m, 0:k], w_refs[li][...],
                      preferred_element_type=jnp.float32)
        acc = jnp.maximum(acc + b_refs[li][...], 0.0)
        if li == n_l - 1:
            o_ref[...] = acc.astype(o_ref.dtype)
        else:
            a_ref = act_refs[li]
            w_store = a_ref.shape[2]
            a_ref[:, :, 0:ow8, :] = acc.astype(a_ref.dtype).reshape(
                bn, oh, ow8, oc)
            if w_store > ow8:
                a_ref[:, :, ow8:w_store, :] = jnp.zeros(
                    (bn, oh, w_store - ow8, oc), a_ref.dtype)
            inp_ref = a_ref


def _fc_kernel(h_ref, w_ref, b_ref, o_ref, *, apply_relu):
    """Single fused Linear over [flatten(h) | action | zero-pad]."""
    acc = jnp.dot(h_ref[...], w_ref[...], preferred_element_type=jnp.float32)
    acc = acc + b_ref[...]
    if apply_relu:
        acc = jnp.maximum(acc, 0.0)
    o_ref[...] = acc.astype(o_ref.dtype)


# ---------------------------------------------------------------------------
# PixelEncoderWithAction (use_batch_norm=False, dropout p=0 -> identity)
# ---------------------------------------------------------------------------
class PixelEncoderWithActionPallas:
    def __init__(self, observation_shape, action_size, filters=None,
                 feature_size=512, discrete_action=False,
                 exclude_last_activation=False, key=None,
                 batch_tile=32, compute_dtype=jnp.bfloat16):
        # TODO(synk): use_batch_norm=True and dropout_rate>0 (train-mode noise)
        # are not implemented; module defaults (False / p=0) are identities.
        if filters is None:
            filters = [[32, 8, 4], [64, 4, 2], [64, 3, 1]]
        if feature_size is None:
            feature_size = 512
        if key is None:
            key = jax.random.PRNGKey(0)
        self.discrete_action = discrete_action
        self.action_size = action_size
        self.exclude_last_activation = exclude_last_activation
        self.batch_tile = int(batch_tile)
        self.compute_dtype = compute_dtype
        self.feature_size = feature_size

        c, h, w = observation_shape
        keys = jax.random.split(key, 2 * len(filters) + 2)
        ki = 0
        layers = []
        self._ref_conv = []                 # fp32 torch-layout (reference)
        for out_c, k, s in filters:
            fan_in = c * k * k
            bound = 1.0 / math.sqrt(fan_in)
            w_t = jax.random.uniform(keys[ki], (out_c, c, k, k), jnp.float32,
                                     -bound, bound)
            b_t = jax.random.uniform(keys[ki + 1], (out_c,), jnp.float32,
                                     -bound, bound)
            ki += 2
            self._ref_conv.append((w_t, b_t, s))

            oh = (h - k) // s + 1
            ow = (w - k) // s + 1
            khe = -(-k // s)
            kwe = khe
            ow8 = _round_up(ow, 8)
            cin = s * s * c
            layers.append(dict(
                s=s, k=k, khe=khe, kwe=kwe, oh=oh, ow=ow, ow8=ow8,
                ph=oh - 1 + khe, pw=ow - 1 + kwe, in_w=ow8 + kwe - 1,
                cin=cin, oc=out_c,
                w=_fold_conv_weight(w_t, s).astype(compute_dtype),
                b=b_t.reshape(1, out_c).astype(jnp.float32),
            ))
            c, h, w = out_c, oh, ow
        self._conv_layers = layers
        self.cnn_output_size = c * h * w

        # Group layers into fused segments: a new segment only starts at an
        # inner stride>1 conv (its space-to-depth fold runs in XLA between the
        # two pallas_calls).  All stride-1 layers stay fused with their
        # predecessor so intermediate activations never round-trip HBM.
        # TODO(synk): the inner-stride fold could also be moved in-kernel to
        # remove the remaining HBM round trip for stride>1 boundaries.
        groups = []
        cur = [0]
        for i in range(1, len(layers)):
            if layers[i]["s"] > 1:
                groups.append(cur)
                cur = [i]
            else:
                cur.append(i)
        groups.append(cur)

        self._segments = []
        for idxs in groups:
            seg_layers = [layers[i] for i in idxs]
            w_store = tuple(
                max(seg_layers[j]["ow8"], seg_layers[j + 1]["in_w"])
                for j in range(len(seg_layers) - 1))
            meta = tuple(dict(oh=L["oh"], ow8=L["ow8"], cin=L["cin"],
                              oc=L["oc"], khe=L["khe"], kwe=L["kwe"])
                         for L in seg_layers)
            self._segments.append(dict(
                layer_idx=tuple(idxs), meta=meta, w_store=w_store,
                m_max=max(L["oh"] * L["ow8"] for L in seg_layers),  # per sample
                k_max=max(L["khe"] * L["kwe"] * L["cin"] for L in seg_layers),
            ))

        # Fused Linear over concat(flatten(h), action): the action rows are
        # folded into the same lane-padded bf16 weight -> single matmul.
        fc_in = self.cnn_output_size + action_size
        bound = 1.0 / math.sqrt(fc_in)
        fc_w = jax.random.uniform(keys[ki], (fc_in, feature_size), jnp.float32,
                                  -bound, bound)
        fc_b = jax.random.uniform(keys[ki + 1], (feature_size,), jnp.float32,
                                  -bound, bound)
        self._ref_fc = (fc_w, fc_b)
        self.d_in = fc_in
        self.d_pad = _round_up(fc_in, 128)
        w_pad = jnp.zeros((self.d_pad, feature_size), jnp.float32)
        w_pad = w_pad.at[:fc_in].set(fc_w)
        self.fc_w = w_pad.astype(compute_dtype)
        self.fc_b = fc_b.reshape(1, feature_size).astype(jnp.float32)

        self._vmem_limit = _vmem_limit_bytes()
        self._jit_forward = jax.jit(self._forward)

    # ------------------------------------------------------------------ #
    def _run_segment(self, h, seg, bn, n_pad, steps):
        layers = [self._conv_layers[i] for i in seg["layer_idx"]]
        L0, last = layers[0], layers[-1]
        x = _fold_input_nhwc(h, L0)
        m_blk = bn * last["oh"] * last["ow8"]

        in_specs = [pl.BlockSpec((bn, L0["ph"], L0["in_w"], L0["cin"]),
                                 lambda i: (i, 0, 0, 0))]
        operands = [x]
        flops = 0
        bytes_accessed = int(x.size) * 2
        for L in layers:
            # TODO(synk): constant-operand weights could use
            # pipeline_mode=pl.Buffered(1) to avoid double-buffering on v7x.
            in_specs.append(pl.BlockSpec(tuple(L["w"].shape), lambda i: (0, 0)))
            in_specs.append(pl.BlockSpec(tuple(L["b"].shape), lambda i: (0, 0)))
            operands += [L["w"], L["b"]]
            flops += (2 * n_pad * L["oh"] * L["ow8"]
                      * L["khe"] * L["kwe"] * L["cin"] * L["oc"])
            bytes_accessed += int(L["w"].size) * 2 + int(L["b"].size) * 4
        bytes_accessed += n_pad * last["oh"] * last["ow8"] * last["oc"] * 2

        scratch = [pltpu.VMEM((bn * seg["m_max"], seg["k_max"]),
                              self.compute_dtype)]
        for j, L in enumerate(layers[:-1]):
            scratch.append(pltpu.VMEM((bn, L["oh"], seg["w_store"][j], L["oc"]),
                                      self.compute_dtype))

        out = pl.pallas_call(
            functools.partial(_conv_segment_kernel, meta=seg["meta"], bn=bn),
            out_shape=jax.ShapeDtypeStruct(
                (n_pad * last["oh"] * last["ow8"], last["oc"]),
                self.compute_dtype),
            grid=(steps,),
            in_specs=in_specs,
            out_specs=pl.BlockSpec((m_blk, last["oc"]), lambda i: (i, 0)),
            scratch_shapes=scratch,
            compiler_params=_mosaic_params(self._vmem_limit),
            cost_estimate=pl.CostEstimate(flops=int(flops), transcendentals=0,
                                          bytes_accessed=int(bytes_accessed)),
        )(*operands)

        out = out.reshape(n_pad, last["oh"], last["ow8"], last["oc"])
        return out[:, :, :last["ow"], :]

    def _run_fc(self, hc, n_pad):
        f = self.feature_size
        d = self.d_pad
        bm = _pick_row_tile(n_pad, 256)
        steps = n_pad // bm
        flops = 2 * n_pad * d * f
        bytes_accessed = n_pad * d * 2 + d * f * 2 + f * 4 + n_pad * f * 4
        return pl.pallas_call(
            functools.partial(_fc_kernel,
                              apply_relu=not self.exclude_last_activation),
            out_shape=jax.ShapeDtypeStruct((n_pad, f), jnp.float32),
            grid=(steps,),
            in_specs=[
                pl.BlockSpec((bm, d), lambda i: (i, 0)),
                pl.BlockSpec((d, f), lambda i: (0, 0)),
                pl.BlockSpec((1, f), lambda i: (0, 0)),
            ],
            out_specs=pl.BlockSpec((bm, f), lambda i: (i, 0)),
            compiler_params=_mosaic_params(self._vmem_limit),
            cost_estimate=pl.CostEstimate(flops=int(flops), transcendentals=0,
                                          bytes_accessed=int(bytes_accessed)),
        )(hc, self.fc_w, self.fc_b)

    # ------------------------------------------------------------------ #
    def _forward(self, x, action):
        n = x.shape[0]
        if self.discrete_action:
            act = jax.nn.one_hot(action.reshape(-1).astype(jnp.int32),
                                 self.action_size, dtype=jnp.float32)
        else:
            act = action.astype(jnp.float32)

        # NCHW -> NHWC once; bf16 activations.
        h = jnp.transpose(x.astype(self.compute_dtype), (0, 2, 3, 1))

        bn = n if n <= self.batch_tile else self.batch_tile
        n_pad = _round_up(n, bn)
        if n_pad != n:
            h = jnp.pad(h, ((0, n_pad - n), (0, 0), (0, 0), (0, 0)))
            act = jnp.pad(act, ((0, n_pad - n), (0, 0)))
        steps = n_pad // bn

        for seg in self._segments:
            h = self._run_segment(h, seg, bn, n_pad, steps)

        # torch's (C, H, W) flatten order, then fuse the action into the same
        # lane-padded FC operand (single matmul in the kernel).
        # TODO(synk): this permute could be folded into the last conv's store.
        h = jnp.transpose(h, (0, 3, 1, 2)).reshape(n_pad, -1)
        hc = jnp.concatenate([h, act.astype(self.compute_dtype)], axis=1)
        if hc.shape[1] != self.d_pad:
            hc = jnp.pad(hc, ((0, 0), (0, self.d_pad - hc.shape[1])))

        out = self._run_fc(hc, n_pad)
        return out[:n]

    def __call__(self, x, action):
        return self._jit_forward(x, action)


# ---------------------------------------------------------------------------
# Pure-JAX reference (fp32) for a numerical sanity check
# ---------------------------------------------------------------------------
def _reference_forward(x, action, encoder):
    h = x
    for w, b, s in encoder._ref_conv:
        h = jax.lax.conv_general_dilated(
            h, w, window_strides=(s, s), padding="VALID",
            dimension_numbers=("NCHW", "OIHW", "NCHW"))
        h = jax.nn.relu(h + b.reshape(1, -1, 1, 1))
    h = h.reshape(h.shape[0], -1)
    if encoder.discrete_action:
        a = jax.nn.one_hot(action.reshape(-1).astype(jnp.int32),
                           encoder.action_size, dtype=jnp.float32)
    else:
        a = action.astype(jnp.float32)
    fc_w, fc_b = encoder._ref_fc
    z = jnp.concatenate([h, a], axis=1) @ fc_w + fc_b
    if not encoder.exclude_last_activation:
        z = jax.nn.relu(z)
    return z


if __name__ == "__main__":
    key = jax.random.PRNGKey(0)

    # --- Test 1: continuous action; whole CNN + FC path, single fused
    #             conv segment (stride-1 second layer) --------------------
    k_obs, k_act, k_params = jax.random.split(jax.random.fold_in(key, 1), 3)
    observation_shape = (4, 16, 16)          # (C, H, W)
    batch, action_size, feature_size = 2, 6, 32
    filters = [[8, 4, 2], [16, 3, 1]]        # [[out_ch, kernel, stride], ...]

    x = jax.random.uniform(k_obs, (batch,) + observation_shape, jnp.float32)
    action = jax.random.uniform(k_act, (batch, action_size), jnp.float32)

    enc = PixelEncoderWithActionPallas(
        observation_shape=observation_shape, action_size=action_size,
        filters=filters, feature_size=feature_size,
        discrete_action=False, key=k_params)

    out = jax.block_until_ready(enc(x, action))
    assert out.shape == (batch, feature_size), out.shape
    assert out.dtype == jnp.float32, out.dtype
    ref = jax.block_until_ready(_reference_forward(x, action, enc))
    np.testing.assert_allclose(np.asarray(out), np.asarray(ref),
                               atol=5e-2, rtol=5e-2)

    # --- Test 2: discrete action, inner strided layer (two fused segments
    #             with an XLA fold between them), k % s != 0 zero-row path,
    #             batch padding + multi-step grid, exclude_last_activation --
    k_obs2, k_act2, k_params2 = jax.random.split(jax.random.fold_in(key, 2), 3)
    observation_shape2 = (3, 20, 20)
    batch2, action_size2, feature_size2 = 10, 5, 16
    filters2 = [[8, 3, 2], [16, 4, 2]]

    x2 = jax.random.uniform(k_obs2, (batch2,) + observation_shape2, jnp.float32)
    action2 = jax.random.randint(k_act2, (batch2,), 0, action_size2, jnp.int32)

    enc2 = PixelEncoderWithActionPallas(
        observation_shape=observation_shape2, action_size=action_size2,
        filters=filters2, feature_size=feature_size2,
        discrete_action=True, exclude_last_activation=True,
        key=k_params2, batch_tile=4)

    out2 = jax.block_until_ready(enc2(x2, action2))
    assert out2.shape == (batch2, feature_size2), out2.shape
    ref2 = jax.block_until_ready(_reference_forward(x2, action2, enc2))
    np.testing.assert_allclose(np.asarray(out2), np.asarray(ref2),
                               atol=5e-2, rtol=5e-2)

    print("KERNEL_OK")
</pallas_src>

<mosaic_0001>
module attributes {stable_mosaic.version = 11 : i64} {
  func.func @_conv_segment_kernel(%arg0: i32, %arg1: memref<2x8x9x16xbf16, #tpu.memory_space<vmem>>, %arg2: memref<64x8xbf16, #tpu.memory_space<vmem>>, %arg3: memref<1x8xf32, #tpu.memory_space<vmem>>, %arg4: memref<72x16xbf16, #tpu.memory_space<vmem>>, %arg5: memref<1x16xf32, #tpu.memory_space<vmem>>, %arg6: memref<80x16xbf16, #tpu.memory_space<vmem>>, %arg7: memref<112x72xbf16, #tpu.memory_space<vmem>>, %arg8: memref<2x7x10x8xbf16, #tpu.memory_space<vmem>>) attributes {dimension_semantics = [#tpu.dimension_semantics<parallel>], iteration_bounds = array<i64: 1>, scalar_prefetch = 0 : i64, scratch_operands = 2 : i64, tpu.core_type = #tpu.core_type<tc>, window_params = [{transform_indices = @transform_0, window_bounds = array<i64: 2, 8, 9, 16>}, {pipeline_mode = #tpu.pipeline_mode<synchronous>, transform_indices = @transform_1, window_bounds = array<i64: 64, 8>}, {pipeline_mode = #tpu.pipeline_mode<synchronous>, transform_indices = @transform_2, window_bounds = array<i64: 1, 8>}, {pipeline_mode = #tpu.pipeline_mode<synchronous>, transform_indices = @transform_3, window_bounds = array<i64: 72, 16>}, {pipeline_mode = #tpu.pipeline_mode<synchronous>, transform_indices = @transform_4, window_bounds = array<i64: 1, 16>}, {transform_indices = @transform_5, window_bounds = array<i64: 80, 16>}]} {
    %c0 = arith.constant 0 : index
    %c0_0 = arith.constant 0 : index
    %c0_1 = arith.constant 0 : index
    %c0_2 = arith.constant 0 : index
    %0 = vector.load %arg1[%c0, %c0_0, %c0_1, %c0_2] : memref<2x8x9x16xbf16, #tpu.memory_space<vmem>>, vector<2x7x8x16xbf16>
    %1 = vector.shape_cast %0 : vector<2x7x8x16xbf16> to vector<112x16xbf16>
    %c0_3 = arith.constant 0 : index
    %c0_4 = arith.constant 0 : index
    %2 = vector.load %arg7[%c0_3, %c0_4] : memref<112x72xbf16, #tpu.memory_space<vmem>>, vector<112x16xbf16>
    tpu.vector_store %arg7[%c0_3, %c0_4], %1 {strides = array<i32>} : memref<112x72xbf16, #tpu.memory_space<vmem>>, vector<112x16xbf16>,
    %c0_5 = arith.constant 0 : index
    %c0_6 = arith.constant 0 : index
    %c1 = arith.constant 1 : index
    %c0_7 = arith.constant 0 : index
    %3 = vector.load %arg1[%c0_5, %c0_6, %c1, %c0_7] : memref<2x8x9x16xbf16, #tpu.memory_space<vmem>>, vector<2x7x8x16xbf16>
    %4 = vector.shape_cast %3 : vector<2x7x8x16xbf16> to vector<112x16xbf16>
    %c0_8 = arith.constant 0 : index
    %c16 = arith.constant 16 : index
    %5 = vector.load %arg7[%c0_8, %c16] : memref<112x72xbf16, #tpu.memory_space<vmem>>, vector<112x16xbf16>
    tpu.vector_store %arg7[%c0_8, %c16], %4 {strides = array<i32>} : memref<112x72xbf16, #tpu.memory_space<vmem>>, vector<112x16xbf16>,
    %c0_9 = arith.constant 0 : index
    %c1_10 = arith.constant 1 : index
    %c0_11 = arith.constant 0 : index
    %c0_12 = arith.constant 0 : index
    %6 = vector.load %arg1[%c0_9, %c1_10, %c0_11, %c0_12] : memref<2x8x9x16xbf16, #tpu.memory_space<vmem>>, vector<2x7x8x16xbf16>
    %7 = vector.shape_cast %6 : vector<2x7x8x16xbf16> to vector<112x16xbf16>
    %c0_13 = arith.constant 0 : index
    %c32 = arith.constant 32 : index
    %8 = vector.load %arg7[%c0_13, %c32] : memref<112x72xbf16, #tpu.memory_space<vmem>>, vector<112x16xbf16>
    tpu.vector_store %arg7[%c0_13, %c32], %7 {strides = array<i32>} : memref<112x72xbf16, #tpu.memory_space<vmem>>, vector<112x16xbf16>,
    %c0_14 = arith.constant 0 : index
    %c1_15 = arith.constant 1 : index
    %c1_16 = arith.constant 1 : index
    %c0_17 = arith.constant 0 : index
    %9 = vector.load %arg1[%c0_14, %c1_15, %c1_16, %c0_17] : memref<2x8x9x16xbf16, #tpu.memory_space<vmem>>, vector<2x7x8x16xbf16>
    %10 = vector.shape_cast %9 : vector<2x7x8x16xbf16> to vector<112x16xbf16>
    %c0_18 = arith.constant 0 : index
    %c48 = arith.constant 48 : index
    %11 = vector.load %arg7[%c0_18, %c48] : memref<112x72xbf16, #tpu.memory_space<vmem>>, vector<112x16xbf16>
    tpu.vector_store %arg7[%c0_18, %c48], %10 {strides = array<i32>} : memref<112x72xbf16, #tpu.memory_space<vmem>>, vector<112x16xbf16>,
    %c0_19 = arith.constant 0 : index
    %c0_20 = arith.constant 0 : index
    %12 = vector.load %arg7[%c0_19, %c0_20] : memref<112x72xbf16, #tpu.memory_space<vmem>>, vector<112x64xbf16>
    %c0_21 = arith.constant 0 : index
    %c0_22 = arith.constant 0 : index
    %13 = vector.load %arg2[%c0_21, %c0_22] : memref<64x8xbf16, #tpu.memory_space<vmem>>, vector<64x8xbf16>
    %cst = arith.constant dense<0.000000e+00> : vector<112x8xf32>
    %14 = tpu.matmul %12, %13, %cst {dimension_numbers = #tpu.dot_dimension_numbers<[1], [0], [0], [1], [0, 0, 1, 1], [], []>} : vector<112x64xbf16>, vector<64x8xbf16>, vector<112x8xf32> -> vector<112x8xf32>
    %c0_23 = arith.constant 0 : index
    %c0_24 = arith.constant 0 : index
    %15 = vector.load %arg3[%c0_23, %c0_24] : memref<1x8xf32, #tpu.memory_space<vmem>>, vector<1x8xf32>
    %16 = vector.broadcast %15 : vector<1x8xf32> to vector<112x8xf32>
    %17 = arith.addf %14, %16 : vector<112x8xf32>
    %cst_25 = arith.constant 0.000000e+00 : f32
    %18 = vector.broadcast %cst_25 : f32 to vector<112x8xf32>
    %19 = arith.maximumf %17, %18 : vector<112x8xf32>
    %20 = arith.truncf %19 : vector<112x8xf32> to vector<112x8xbf16>
    %21 = vector.shape_cast %20 : vector<112x8xbf16> to vector<2x7x8x8xbf16>
    %c0_26 = arith.constant 0 : index
    %c0_27 = arith.constant 0 : index
    %c0_28 = arith.constant 0 : index
    %c0_29 = arith.constant 0 : index
    %22 = vector.load %arg8[%c0_26, %c0_27, %c0_28, %c0_29] : memref<2x7x10x8xbf16, #tpu.memory_space<vmem>>, vector<2x7x8x8xbf16>
    tpu.vector_store %arg8[%c0_26, %c0_27, %c0_28, %c0_29], %21 {strides = array<i32>} : memref<2x7x10x8xbf16, #tpu.memory_space<vmem>>, vector<2x7x8x8xbf16>,
    %cst_30 = arith.constant 0.000000e+00 : bf16
    %23 = vector.broadcast %cst_30 : bf16 to vector<2x7x2x8xbf16>
    %c0_31 = arith.constant 0 : index
    %c0_32 = arith.constant 0 : index
    %c8 = arith.constant 8 : index
    %c0_33 = arith.constant 0 : index
    %24 = vector.load %arg8[%c0_31, %c0_32, %c8, %c0_33] : memref<2x7x10x8xbf16, #tpu.memory_space<vmem>>, vector<2x7x2x8xbf16>
    tpu.vector_store %arg8[%c0_31, %c0_32, %c8, %c0_33], %23 {strides = array<i32>} : memref<2x7x10x8xbf16, #tpu.memory_space<vmem>>, vector<2x7x2x8xbf16>,
    %c0_34 = arith.constant 0 : index
    %c0_35 = arith.constant 0 : index
    %c0_36 = arith.constant 0 : index
    %c0_37 = arith.constant 0 : index
    %25 = vector.load %arg8[%c0_34, %c0_35, %c0_36, %c0_37] : memref<2x7x10x8xbf16, #tpu.memory_space<vmem>>, vector<2x5x8x8xbf16>
    %26 = vector.shape_cast %25 : vector<2x5x8x8xbf16> to vector<80x8xbf16>
    %c0_38 = arith.constant 0 : index
    %c0_39 = arith.constant 0 : index
    %27 = vector.load %arg7[%c0_38, %c0_39] : memref<112x72xbf16, #tpu.memory_space<vmem>>, vector<80x8xbf16>
    tpu.vector_store %arg7[%c0_38, %c0_39], %26 {strides = array<i32>} : memref<112x72xbf16, #tpu.memory_space<vmem>>, vector<80x8xbf16>,
    %c0_40 = arith.constant 0 : index
    %c0_41 = arith.constant 0 : index
    %c1_42 = arith.constant 1 : index
    %c0_43 = arith.constant 0 : index
    %28 = vector.load %arg8[%c0_40, %c0_41, %c1_42, %c0_43] : memref<2x7x10x8xbf16, #tpu.memory_space<vmem>>, vector<2x5x8x8xbf16>
    %29 = vector.shape_cast %28 : vector<2x5x8x8xbf16> to vector<80x8xbf16>
    %c0_44 = arith.constant 0 : index
    %c8_45 = arith.constant 8 : index
    %30 = vector.load %arg7[%c0_44, %c8_45] : memref<112x72xbf16, #tpu.memory_space<vmem>>, vector<80x8xbf16>
    tpu.vector_store %arg7[%c0_44, %c8_45], %29 {strides = array<i32>} : memref<112x72xbf16, #tpu.memory_space<vmem>>, vector<80x8xbf16>,
    %c0_46 = arith.constant 0 : index
    %c0_47 = arith.constant 0 : index
    %c2 = arith.constant 2 : index
    %c0_48 = arith.constant 0 : index
    %31 = vector.load %arg8[%c0_46, %c0_47, %c2, %c0_48] : memref<2x7x10x8xbf16, #tpu.memory_space<vmem>>, vector<2x5x8x8xbf16>
    %32 = vector.shape_cast %31 : vector<2x5x8x8xbf16> to vector<80x8xbf16>
    %c0_49 = arith.constant 0 : index
    %c16_50 = arith.constant 16 : index
    %33 = vector.load %arg7[%c0_49, %c16_50] : memref<112x72xbf16, #tpu.memory_space<vmem>>, vector<80x8xbf16>
    tpu.vector_store %arg7[%c0_49, %c16_50], %32 {strides = array<i32>} : memref<112x72xbf16, #tpu.memory_space<vmem>>, vector<80x8xbf16>,
    %c0_51 = arith.constant 0 : index
    %c1_52 = arith.constant 1 : index
    %c0_53 = arith.constant 0 : index
    %c0_54 = arith.constant 0 : index
    %34 = vector.load %arg8[%c0_51, %c1_52, %c0_53, %c0_54] : memref<2x7x10x8xbf16, #tpu.memory_space<vmem>>, vector<2x5x8x8xbf16>
    %35 = vector.shape_cast %34 : vector<2x5x8x8xbf16> to vector<80x8xbf16>
    %c0_55 = arith.constant 0 : index
    %c24 = arith.constant 24 : index
    %36 = vector.load %arg7[%c0_55, %c24] : memref<112x72xbf16, #tpu.memory_space<vmem>>, vector<80x8xbf16>
    tpu.vector_store %arg7[%c0_55, %c24], %35 {strides = array<i32>} : memref<112x72xbf16, #tpu.memory_space<vmem>>, vector<80x8xbf16>,
    %c0_56 = arith.constant 0 : index
    %c1_57 = arith.constant 1 : index
    %c1_58 = arith.constant 1 : index
    %c0_59 = arith.constant 0 : index
    %37 = vector.load %arg8[%c0_56, %c1_57, %c1_58, %c0_59] : memref<2x7x10x8xbf16, #tpu.memory_space<vmem>>, vector<2x5x8x8xbf16>
    %38 = vector.shape_cast %37 : vector<2x5x8x8xbf16> to vector<80x8xbf16>
    %c0_60 = arith.constant 0 : index
    %c32_61 = arith.constant 32 : index
    %39 = vector.load %arg7[%c0_60, %c32_61] : memref<112x72xbf16, #tpu.memory_space<vmem>>, vector<80x8xbf16>
    tpu.vector_store %arg7[%c0_60, %c32_61], %38 {strides = array<i32>} : memref<112x72xbf16, #tpu.memory_space<vmem>>, vector<80x8xbf16>,
    %c0_62 = arith.constant 0 : index
    %c1_63 = arith.constant 1 : index
    %c2_64 = arith.constant 2 : index
    %c0_65 = arith.constant 0 : index
    %40 = vector.load %arg8[%c0_62, %c1_63, %c2_64, %c0_65] : memref<2x7x10x8xbf16, #tpu.memory_space<vmem>>, vector<2x5x8x8xbf16>
    %41 = vector.shape_cast %40 : vector<2x5x8x8xbf16> to vector<80x8xbf16>
    %c0_66 = arith.constant 0 : index
    %c40 = arith.constant 40 : index
    %42 = vector.load %arg7[%c0_66, %c40] : memref<112x72xbf16, #tpu.memory_space<vmem>>, vector<80x8xbf16>
    tpu.vector_store %arg7[%c0_66, %c40], %41 {strides = array<i32>} : memref<112x72xbf16, #tpu.memory_space<vmem>>, vector<80x8xbf16>,
    %c0_67 = arith.constant 0 : index
    %c2_68 = arith.constant 2 : index
    %c0_69 = arith.constant 0 : index
    %c0_70 = arith.constant 0 : index
    %43 = vector.load %arg8[%c0_67, %c2_68, %c0_69, %c0_70] : memref<2x7x10x8xbf16, #tpu.memory_space<vmem>>, vector<2x5x8x8xbf16>
    %44 = vector.shape_cast %43 : vector<2x5x8x8xbf16> to vector<80x8xbf16>
    %c0_71 = arith.constant 0 : index
    %c48_72 = arith.constant 48 : index
    %45 = vector.load %arg7[%c0_71, %c48_72] : memref<112x72xbf16, #tpu.memory_space<vmem>>, vector<80x8xbf16>
    tpu.vector_store %arg7[%c0_71, %c48_72], %44 {strides = array<i32>} : memref<112x72xbf16, #tpu.memory_space<vmem>>, vector<80x8xbf16>,
    %c0_73 = arith.constant 0 : index
    %c2_74 = arith.constant 2 : index
    %c1_75 = arith.constant 1 : index
    %c0_76 = arith.constant 0 : index
    %46 = vector.load %arg8[%c0_73, %c2_74, %c1_75, %c0_76] : memref<2x7x10x8xbf16, #tpu.memory_space<vmem>>, vector<2x5x8x8xbf16>
    %47 = vector.shape_cast %46 : vector<2x5x8x8xbf16> to vector<80x8xbf16>
    %c0_77 = arith.constant 0 : index
    %c56 = arith.constant 56 : index
    %48 = vector.load %arg7[%c0_77, %c56] : memref<112x72xbf16, #tpu.memory_space<vmem>>, vector<80x8xbf16>
    tpu.vector_store %arg7[%c0_77, %c56], %47 {strides = array<i32>} : memref<112x72xbf16, #tpu.memory_space<vmem>>, vector<80x8xbf16>,
    %c0_78 = arith.constant 0 : index
    %c2_79 = arith.constant 2 : index
    %c2_80 = arith.constant 2 : index
    %c0_81 = arith.constant 0 : index
    %49 = vector.load %arg8[%c0_78, %c2_79, %c2_80, %c0_81] : memref<2x7x10x8xbf16, #tpu.memory_space<vmem>>, vector<2x5x8x8xbf16>
    %50 = vector.shape_cast %49 : vector<2x5x8x8xbf16> to vector<80x8xbf16>
    %c0_82 = arith.constant 0 : index
    %c64 = arith.constant 64 : index
    %51 = vector.load %arg7[%c0_82, %c64] : memref<112x72xbf16, #tpu.memory_space<vmem>>, vector<80x8xbf16>
    tpu.vector_store %arg7[%c0_82, %c64], %50 {strides = array<i32>} : memref<112x72xbf16, #tpu.memory_space<vmem>>, vector<80x8xbf16>,
    %c0_83 = arith.constant 0 : index
    %c0_84 = arith.constant 0 : index
    %52 = vector.load %arg7[%c0_83, %c0_84] : memref<112x72xbf16, #tpu.memory_space<vmem>>, vector<80x72xbf16>
    %c0_85 = arith.constant 0 : index
    %c0_86 = arith.constant 0 : index
    %53 = vector.load %arg4[%c0_85, %c0_86] : memref<72x16xbf16, #tpu.memory_space<vmem>>, vector<72x16xbf16>
    %cst_87 = arith.constant dense<0.000000e+00> : vector<80x16xf32>
    %54 = tpu.matmul %52, %53, %cst_87 {dimension_numbers = #tpu.dot_dimension_numbers<[1], [0], [0], [1], [0, 0, 1, 1], [], []>} : vector<80x72xbf16>, vector<72x16xbf16>, vector<80x16xf32> -> vector<80x16xf32>
    %c0_88 = arith.constant 0 : index
    %c0_89 = arith.constant 0 : index
    %55 = vector.load %arg5[%c0_88, %c0_89] : memref<1x16xf32, #tpu.memory_space<vmem>>, vector<1x16xf32>
    %56 = vector.broadcast %55 : vector<1x16xf32> to vector<80x16xf32>
    %57 = arith.addf %54, %56 : vector<80x16xf32>
    %cst_90 = arith.constant 0.000000e+00 : f32
    %58 = vector.broadcast %cst_90 : f32 to vector<80x16xf32>
    %59 = arith.maximumf %57, %58 : vector<80x16xf32>
    %60 = arith.truncf %59 : vector<80x16xf32> to vector<80x16xbf16>
    %c0_91 = arith.constant 0 : index
    %c0_92 = arith.constant 0 : index
    %61 = vector.load %arg6[%c0_91, %c0_92] : memref<80x16xbf16, #tpu.memory_space<vmem>>, vector<80x16xbf16>
    tpu.vector_store %arg6[%c0_91, %c0_92], %60 {strides = array<i32>} : memref<80x16xbf16, #tpu.memory_space<vmem>>, vector<80x16xbf16>,
    return
  }
  func.func @transform_0(%arg0: i32) -> (i32, i32, i32, i32) {
    %c0_i32 = arith.constant 0 : i32
    %c0_i32_0 = arith.constant 0 : i32
    %c0_i32_1 = arith.constant 0 : i32
    %c0_i32_2 = arith.constant 0 : i32
    return %arg0, %c0_i32, %c0_i32_0, %c0_i32_1 : i32, i32, i32, i32
  }
  func.func @transform_1(%arg0: i32) -> (i32, i32) {
    %c0_i32 = arith.constant 0 : i32
    %c0_i32_0 = arith.constant 0 : i32
    %c0_i32_1 = arith.constant 0 : i32
    return %c0_i32, %c0_i32_0 : i32, i32
  }
  func.func @transform_2(%arg0: i32) -> (i32, i32) {
    %c0_i32 = arith.constant 0 : i32
    %c0_i32_0 = arith.constant 0 : i32
    %c0_i32_1 = arith.constant 0 : i32
    return %c0_i32, %c0_i32_0 : i32, i32
  }
  func.func @transform_3(%arg0: i32) -> (i32, i32) {
    %c0_i32 = arith.constant 0 : i32
    %c0_i32_0 = arith.constant 0 : i32
    %c0_i32_1 = arith.constant 0 : i32
    return %c0_i32, %c0_i32_0 : i32, i32
  }
  func.func @transform_4(%arg0: i32) -> (i32, i32) {
    %c0_i32 = arith.constant 0 : i32
    %c0_i32_0 = arith.constant 0 : i32
    %c0_i32_1 = arith.constant 0 : i32
    return %c0_i32, %c0_i32_0 : i32, i32
  }
  func.func @transform_5(%arg0: i32) -> (i32, i32) {
    %c0_i32 = arith.constant 0 : i32
    %c0_i32_0 = arith.constant 0 : i32
    return %arg0, %c0_i32 : i32, i32
  }
}

module attributes {stable_mosaic.version = 11 : i64} {
  func.func @_fc_kernel(%arg0: i32, %arg1: memref<2x512xbf16, #tpu.memory_space<vmem>>, %arg2: memref<512x32xbf16, #tpu.memory_space<vmem>>, %arg3: memref<1x32xf32, #tpu.memory_space<vmem>>, %arg4: memref<2x32xf32, #tpu.memory_space<vmem>>) attributes {dimension_semantics = [#tpu.dimension_semantics<parallel>], iteration_bounds = array<i64: 1>, scalar_prefetch = 0 : i64, scratch_operands = 0 : i64, tpu.core_type = #tpu.core_type<tc>, window_params = [{transform_indices = @transform_0, window_bounds = array<i64: 2, 512>}, {pipeline_mode = #tpu.pipeline_mode<synchronous>, transform_indices = @transform_1, window_bounds = array<i64: 512, 32>}, {pipeline_mode = #tpu.pipeline_mode<synchronous>, transform_indices = @transform_2, window_bounds = array<i64: 1, 32>}, {transform_indices = @transform_3, window_bounds = array<i64: 2, 32>}]} {
    %c0 = arith.constant 0 : index
    %c0_0 = arith.constant 0 : index
    %0 = vector.load %arg1[%c0, %c0_0] : memref<2x512xbf16, #tpu.memory_space<vmem>>, vector<2x512xbf16>
    %c0_1 = arith.constant 0 : index
    %c0_2 = arith.constant 0 : index
    %1 = vector.load %arg2[%c0_1, %c0_2] : memref<512x32xbf16, #tpu.memory_space<vmem>>, vector<512x32xbf16>
    %cst = arith.constant dense<0.000000e+00> : vector<2x32xf32>
    %2 = tpu.matmul %0, %1, %cst {dimension_numbers = #tpu.dot_dimension_numbers<[1], [0], [0], [1], [0, 0, 1, 1], [], []>} : vector<2x512xbf16>, vector<512x32xbf16>, vector<2x32xf32> -> vector<2x32xf32>
    %c0_3 = arith.constant 0 : index
    %c0_4 = arith.constant 0 : index
    %3 = vector.load %arg3[%c0_3, %c0_4] : memref<1x32xf32, #tpu.memory_space<vmem>>, vector<1x32xf32>
    %4 = vector.broadcast %3 : vector<1x32xf32> to vector<2x32xf32>
    %5 = arith.addf %2, %4 : vector<2x32xf32>
    %cst_5 = arith.constant 0.000000e+00 : f32
    %6 = vector.broadcast %cst_5 : f32 to vector<2x32xf32>
    %7 = arith.maximumf %5, %6 : vector<2x32xf32>
    %c0_6 = arith.constant 0 : index
    %c0_7 = arith.constant 0 : index
    %8 = vector.load %arg4[%c0_6, %c0_7] : memref<2x32xf32, #tpu.memory_space<vmem>>, vector<2x32xf32>
    tpu.vector_store %arg4[%c0_6, %c0_7], %7 {strides = array<i32>} : memref<2x32xf32, #tpu.memory_space<vmem>>, vector<2x32xf32>,
    return
  }
  func.func @transform_0(%arg0: i32) -> (i32, i32) {
    %c0_i32 = arith.constant 0 : i32
    %c0_i32_0 = arith.constant 0 : i32
    return %arg0, %c0_i32 : i32, i32
  }
  func.func @transform_1(%arg0: i32) -> (i32, i32) {
    %c0_i32 = arith.constant 0 : i32
    %c0_i32_0 = arith.constant 0 : i32
    %c0_i32_1 = arith.constant 0 : i32
    return %c0_i32, %c0_i32_0 : i32, i32
  }
  func.func @transform_2(%arg0: i32) -> (i32, i32) {
    %c0_i32 = arith.constant 0 : i32
    %c0_i32_0 = arith.constant 0 : i32
    %c0_i32_1 = arith.constant 0 : i32
    return %c0_i32, %c0_i32_0 : i32, i32
  }
  func.func @transform_3(%arg0: i32) -> (i32, i32) {
    %c0_i32 = arith.constant 0 : i32
    %c0_i32_0 = arith.constant 0 : i32
    return %arg0, %c0_i32 : i32, i32
  }
}

</mosaic_0001>

<bundles_post_ra>
// kernel: _forward.3
= control target key start
LH: loop header
LB: loop body
LE: loop exit
PB: predicated region body
PF: predicated region fallthrough
CT: control target
= control target key end

     0   :  { %v100_v30 = vlaneseq  ;;  %v542_v34 = vmov 1966171168   ;;  %s678_s0 = inlined_call_operand.vmem [shape: bf16[2,512], index: 0, kind: input, shape index: {}]   ;;  %s679_s1 = inlined_call_operand.vmem [shape: bf16[512,32], index: 1, kind: input, shape index: {}]   ;;  %s680_s2 = inlined_call_operand.vmem [shape: f32[1,32], index: 2, kind: input, shape index: {}]   ;;  %s681_s3 = inlined_call_operand.hbm [shape: f32[2,32], index: 3, kind: output, shape index: {}]  }
   0x1   :  { %v486_v0 = vld [vmem:[%s679_s1 + $0x40] sm:$0xff]   ;;  %v490_v4 = vld [vmem:[%s679_s1 + $0x48] sm:$0xff]   ;;  %v494_v8 = vld [vmem:[%s679_s1 + $0x50] sm:$0xff]   ;;  %v98_v35 = vunpack.c.l.s4 %v542_v34 }
   0x2   :  { %v487_v1 = vld [vmem:[%s679_s1 + $0xc0] sm:$0xff]   ;;  %440 = vmatprep.subr.bf16.mxu0 %v486_v0  ;;  %v491_v5 = vld [vmem:[%s679_s1 + $0xc8] sm:$0xff]   ;;  %v495_v9 = vld [vmem:[%s679_s1 + $0xd0] sm:$0xff]   ;;  %v101_v36 = vshrl.u32 %v100_v30, 7 }
   0x3   :  { %v488_v2 = vld [vmem:[%s679_s1] sm:$0xff]   ;;  %462 = vmatprep.subr.bf16.mxu1 %v487_v1  ;;  %v492_v6 = vld [vmem:[%s679_s1 + $0x8] sm:$0xff]   ;;  %v496_v10 = vld [vmem:[%s679_s1 + $0x10] sm:$0xff]  }
   0x4   :  { %v489_v3 = vld [vmem:[%s679_s1 + $0x80] sm:$0xff]   ;;  %441 = vmatpush3.bf16.msra.mxu0 %v488_v2  ;;  %v493_v7 = vld [vmem:[%s679_s1 + $0x88] sm:$0xff]   ;;  %v497_v11 = vld [vmem:[%s679_s1 + $0x90] sm:$0xff]  }
   0x5   :  { %463 = vmatpush3.bf16.msra.mxu1 %v489_v3  ;;  %442 = vmatprep.subr.bf16.mxu0 %v490_v4  ;;  %v498_v12 = vld [vmem:[%s679_s1 + $0x58] sm:$0xff]   ;;  %v502_v16 = vld [vmem:[%s679_s1 + $0x60] sm:$0xff]   ;;  %v506_v20 = vld [vmem:[%s679_s1 + $0x68] sm:$0xff]  }
   0x6   :  { %464 = vmatprep.subr.bf16.mxu1 %v491_v5  ;;  %v499_v13 = vld [vmem:[%s679_s1 + $0xd8] sm:$0xff]   ;;  %v503_v17 = vld [vmem:[%s679_s1 + $0xe0] sm:$0xff]   ;;  %v507_v21 = vld [vmem:[%s679_s1 + $0xe8] sm:$0xff]  }
   0x7   :  { %v500_v14 = vld [vmem:[%s679_s1 + $0x18] sm:$0xff]   ;;  %v504_v18 = vld [vmem:[%s679_s1 + $0x20] sm:$0xff]   ;;  %v508_v22 = vld [vmem:[%s679_s1 + $0x28] sm:$0xff]  }
   0x8   :  { %443 = vmatpush3.bf16.msra.mxu0 %v492_v6  ;;  %v501_v15 = vld [vmem:[%s679_s1 + $0x98] sm:$0xff]   ;;  %v505_v19 = vld [vmem:[%s679_s1 + $0xa0] sm:$0xff]   ;;  %v509_v23 = vld [vmem:[%s679_s1 + $0xa8] sm:$0xff]  }
   0x9   :  { %465 = vmatpush3.bf16.msra.mxu1 %v493_v7  ;;  %444 = vmatprep.subr.bf16.mxu0 %v494_v8  ;;  %v510_v24 = vld [vmem:[%s679_s1 + $0x70] sm:$0xff]   ;;  %v514_v28 = vld [vmem:[%s679_s1 + $0x78] sm:$0xff]   ;;  %v407_v33 = vld.sshfl [vmem:[%s678_s0] sm:$0x33 pattern:$0x75316420] }
   0xa   :  { %466 = vmatprep.subr.bf16.mxu1 %v495_v9  ;;  %v511_v25 = vld [vmem:[%s679_s1 + $0xf0] sm:$0xff]   ;;  %v515_v29 = vld [vmem:[%s679_s1 + $0xf8] sm:$0xff]  }
   0xb   :  { %v512_v26 = vld [vmem:[%s679_s1 + $0x30] sm:$0xff]   ;;  %v516_v31 = vld [vmem:[%s679_s1 + $0x38] sm:$0xff]  }
   0xc   :  { %445 = vmatpush3.bf16.msra.mxu0 %v496_v10  ;;  %v513_v27 = vld [vmem:[%s679_s1 + $0xb0] sm:$0xff]   ;;  %v517_v32 = vld [vmem:[%s679_s1 + $0xb8] sm:$0xff]  }
   0xd   :  { %467 = vmatpush3.bf16.msra.mxu1 %v497_v11  ;;  %446 = vmatprep.subr.bf16.mxu0 %v498_v12 }
   0xe   :  { %468 = vmatprep.subr.bf16.mxu1 %v499_v13 }
  0x10   :  { %447 = vmatpush3.bf16.msra.mxu0 %v500_v14 }
  0x11   :  { %469 = vmatpush3.bf16.msra.mxu1 %v501_v15  ;;  %448 = vmatprep.subr.bf16.mxu0 %v502_v16 }
  0x12   :  { %470 = vmatprep.subr.bf16.mxu1 %v503_v17 }
  0x14   :  { %449 = vmatpush3.bf16.msra.mxu0 %v504_v18 }
  0x15   :  { %471 = vmatpush3.bf16.msra.mxu1 %v505_v19  ;;  %450 = vmatprep.subr.bf16.mxu0 %v506_v20 }
  0x16   :  { %472 = vmatprep.subr.bf16.mxu1 %v507_v21 }
  0x18   :  { %451 = vmatpush3.bf16.msra.mxu0 %v508_v22 }
  0x19   :  { %473 = vmatpush3.bf16.msra.mxu1 %v509_v23  ;;  %452 = vmatprep.subr.bf16.mxu0 %v510_v24 }
  0x1a   :  { %474 = vmatprep.subr.bf16.mxu1 %v511_v25 }
  0x1c   :  { %453 = vmatpush3.bf16.msra.mxu0 %v512_v26 }
  0x1d   :  { %475 = vmatpush3.bf16.msra.mxu1 %v513_v27  ;;  %454 = vmatprep.subr.bf16.mxu0 %v514_v28 }
  0x1e   :  { %476 = vmatprep.subr.bf16.mxu1 %v515_v29 }
  0x20   :  { %455 = vmatpush3.bf16.msra.mxu0 %v516_v31 }
  0x21   :  { %477 = vmatpush3.bf16.msra.mxu1 %v517_v32 }
  0x22   :  { %8 = vsyncpa [#allocation3], 0  ;;  %v96_v37 = vcombine.high %v407_v33, %v407_v33  ;;  %v99_v38 = vunpack.c.0.s8 %v98_v35  ;;  %v406_v45 = vld [vmem:[%s680_s2] ss:$0 sm:$0xff]  ;;  %s543_s0 = smov [#allocation2]   ;;  %vm390_vm0 = vcmask 254976  }
  0x23   :  { %s398_s25 = sshll.u32 %s543_s0, 4  ;;  %s399_s25 = int_to_ptr.vmem [resolvable:$true] %s398_s25 }
  0x24   :  { %v102_v39 = vsub.s32 %v99_v38, %v101_v36  ;;  %s518_s26 = scalar_lea.vmem %s399_s25, 32  ;;  %p523_p1 = scmp.lt.s32.totalorder %s399_s25, %s399_s25 }
  0x25   :  { %p519_p0 = scmp.ne.s32.totalorder %s399_s25, %s518_s26  ;;  %p524_p2 = scmp.lt.s32.totalorder %s518_s26, %s518_s26 }
  0x26   :  { %v110_v40 = vrot.slane %v96_v37, %v102_v39  ;;  %v103_v41 = vrot.slane %v407_v33, %v102_v39 }
  0x27   :  { %p525_p3 = por %p524_p2, %p523_p1 }
  0x28   :  { %341 = vmatprep.mubr.bf16.mxu0 %v110_v40  ;;  %v112_v42 = vcombine.high %v110_v40, %v110_v40  ;;  %v111_v43 = vcombine.high %v103_v41, %v103_v41 }
  0x29   :  { %342 = vmatmul.mubr.bf16.vlgmr.msra.gmra.mrb[0].mxu0 %v103_v41  ;;  %p526_p4 = pnand %p525_p3, %p519_p0 }
  0x2a   :  { %381 = vmatprep.mubr.bf16.mxu1 %v112_v42 }
  0x2b   :  { %382 = vmatmul.mubr.bf16.vlgmr.msra.gmra.mrb[0].mxu1 %v111_v43 }
  0xfc   :  { %v456_v44 = vpop.f32.mrb[0].mxu0 }
  0xfd   :  { %v457_v46 = vpop.f32.mrb[1].mxu0 }
  0xfe   :  { %v478_v47 = vpop.f32.mrb[0].mxu1  ;;  %v458_v48 = vadd.f32 %v457_v46, %v456_v44  ;;  %v459_v49 = vpop.f32.mrb[2].mxu0 }
  0xff   :  { %v479_v50 = vpop.f32.mrb[1].mxu1  ;;  %v460_v51 = vpop.f32.mrb[3].mxu0 }
 0x100   :  { %v344_v52 = vadd.f32 %v458_v48, %v406_v45  ;;  %v480_v53 = vadd.f32 %v479_v50, %v478_v47  ;;  %v481_v54 = vpop.f32.mrb[2].mxu1 }
 0x101   :  { %v482_v55 = vpop.f32.mrb[3].mxu1 }
 0x102   :  { %v384_v56 = vadd.f32 %v480_v53, %v344_v52 }
 0x104   :  { %v389_v57 = vmax.f32 %v384_v56, 0.0 }
 0x106   :  { %391 = vst.msk [vmem:[#allocation2] sm:$0x3] %vm390_vm0, %v389_v57 }
 0x107   :  { %529 = shalt.err (!%p526_p4)
}
 0x108   :  { %s530_s28 = scalar_lea.hbm %s681_s3, 32 }
 0x109   :  { %p531_p5 = scmp.ne.s32.totalorder %s681_s3, %s530_s28  ;;  %p534_p6 = scmp.lt.u32.totalorder %s530_s28, %s681_s3 }
 0x10b   :  { %p536_p7 = pnand %p534_p6, %p531_p5 }
 0x10d   :  { %539 = shalt.err (!%p536_p7)
}
 0x10e   :  { %401 = dma.vmem_to_hbm [thread:$0]  %s399_s25, 32, %s681_s3, [#allocation3]  }
 0x10f   :  { %540 = dma.done.wait [#allocation3], 32  }
 0x110   :  { %541 = vsyncadd [#allocation3], 4294967264 }
 0x111   :  { %405 = vsyncpa [#allocation3], 1 }

// kernel: _forward.2
= control target key start
LH: loop header
LB: loop body
LE: loop exit
PB: predicated region body
PF: predicated region fallthrough
CT: control target
= control target key end

     0   :  { %vm113_vm0 = vsmask.f32 3328  ;;  %vm114_vm1 = vsmask.f32 7440  ;;  %s2629_s23 = smov 16   ;;  %s2630_s11 = smov 32   ;;  %s3588_s0 = inlined_call_operand.vmem [shape: bf16[2,8,9,16], index: 0, kind: input, shape index: {}]   ;;  %s3589_s1 = inlined_call_operand.vmem [shape: bf16[64,8], index: 1, kind: input, shape index: {}]   ;;  %s3590_s2 = inlined_call_operand.vmem [shape: f32[1,8], index: 2, kind: input, shape index: {}]   ;;  %s3591_s3 = inlined_call_operand.vmem [shape: bf16[72,16], index: 3, kind: input, shape index: {}]   ;;  %s3592_s4 = inlined_call_operand.vmem [shape: f32[1,16], index: 4, kind: input, shape index: {}]   ;;  %s3593_s5 = inlined_call_operand.vmem [shape: bf16[80,16], index: 5, kind: output, shape index: {}]  }
   0x1   :  { %v85_v0 = vld [vmem:[%s3588_s0] sm:$0xf]  ;;  %v86_v1 = vld [vmem:[%s3588_s0 + $0x4] sm:$0x1]  ;;  %v87_v2 = vld [vmem:[%s3588_s0 + $0x8] sm:$0xf] }
   0x2   :  { %v88_v3 = vld [vmem:[%s3588_s0 + $0xc] sm:$0x1]  ;;  %v117_v4 = vshrl.u32 %v85_v0, 16  ;;  %v120_v5 = vshll.u32 %v85_v0, 16  ;;  %v126_v6 = vshll.u32 %v86_v1, 16  ;;  %v131_v7 = vshrl.u32 %v87_v2, 16  ;;  %vm2696_vm2 = vmor %vm113_vm0, %vm114_vm1 }
   0x3   :  { %v134_v8 = vshll.u32 %v87_v2, 16  ;;  %v140_v9 = vshll.u32 %v88_v3, 16  ;;  %v2312_v16 = vld [vmem:[%s3588_s0 + $0x8] sm:$0xf]  ;;  %v2313_v17 = vld [vmem:[%s3588_s0 + $0xc] sm:$0x1] }
   0x4   :  { %v119_v10 = vrot.slane %v117_v4, 4  ;;  %v122_v11 = vrot.slane %v120_v5, 5  ;;  %v128_v12 = vrot.slane %v126_v6, 5  ;;  %v133_v13 = vrot.slane %v131_v7, 4  ;;  %v2314_v19 = vld [vmem:[%s3588_s0 + $0x10] sm:$0xf] }
   0x5   :  { %v136_v14 = vrot.slane %v134_v8, 5  ;;  %v142_v15 = vrot.slane %v140_v9, 5  ;;  %v2315_v20 = vld [vmem:[%s3588_s0 + $0x14] sm:$0x1]  ;;  %v470_v21 = vshrl.u32 %v2312_v16, 16  ;;  %v473_v22 = vshll.u32 %v2312_v16, 16 }
   0x6   :  { %v123_v18 = vor.u32 %v122_v11, %v119_v10  ;;  %v479_v25 = vshll.u32 %v2313_v17, 16  ;;  %v484_v26 = vshrl.u32 %v2314_v19, 16  ;;  %v487_v27 = vshll.u32 %v2314_v19, 16  ;;  %v89_v28 = vld [vmem:[%s3588_s0 + $0x10] sm:$0xf]  ;;  %s2631_s12 = smov 48  }
   0x7   :  { %v137_v24 = vor.u32 %v136_v14, %v133_v13  ;;  %v472_v30 = vrot.slane %v470_v21, 4  ;;  %v475_v31 = vrot.slane %v473_v22, 5  ;;  %v493_v32 = vshll.u32 %v2315_v20, 16  ;;  %v90_v33 = vld [vmem:[%s3588_s0 + $0x14] sm:$0x1]  ;;  %s2635_s10 = smov 24  }
   0x8   :  { %v124_v29 = vrot.slane %v123_v18, 4  ;;  %v481_v35 = vrot.slane %v479_v25, 5  ;;  %v486_v36 = vrot.slane %v484_v26, 4  ;;  %v489_v37 = vrot.slane %v487_v27, 5  ;;  %v91_v38 = vld [vmem:[%s3588_s0 + $0x18] sm:$0xf] }
   0x9   :  { %v138_v34 = vrot.slane %v137_v24, 4  ;;  %v476_v40 = vor.u32 %v475_v31, %v472_v30  ;;  %v495_v41 = vrot.slane %v493_v32, 5  ;;  %v145_v42 = vshrl.u32 %v89_v28, 16  ;;  %v92_v45 = vld [vmem:[%s3588_s0 + $0x1c] sm:$0x1]  ;;  %s2636_s13 = smov 8  }
   0xa   :  { %v129_v39 = vsel %vm2696_vm2, %v124_v29, %v128_v12  ;;  %v490_v44 = vor.u32 %v489_v37, %v486_v36  ;;  %v148_v46 = vshll.u32 %v89_v28, 16  ;;  %v154_v47 = vshll.u32 %v90_v33, 16  ;;  %v2591_v49 = vld [vmem:[%s3588_s0 + $0x8] ss:$8 sps:$4 sm:$0xff]   ;;  %v2316_v53 = vld [vmem:[%s3588_s0 + $0x18] sm:$0xf] }
   0xb   :  { %v143_v43 = vsel %vm2696_vm2, %v138_v34, %v142_v15  ;;  %v477_v50 = vrot.slane %v476_v40, 4  ;;  %v147_v51 = vrot.slane %v145_v42, 4  ;;  %v159_v52 = vshrl.u32 %v91_v38, 16  ;;  %v2317_v57 = vld [vmem:[%s3588_s0 + $0x1c] sm:$0x1]  ;;  %s2637_s16 = smov 64  }
   0xc   :  { %v2284_v48 = vcombine.low %v129_v39, %v143_v43  ;;  %v491_v54 = vrot.slane %v490_v44, 4  ;;  %v150_v55 = vrot.slane %v148_v46, 5  ;;  %v162_v56 = vshll.u32 %v91_v38, 16  ;;  %v2318_v62 = vld [vmem:[%s3588_s0 + $0x20] sm:$0xf]  ;;  %s2638_s17 = smov 40  }
   0xd   :  { %v482_v58 = vsel %vm2696_vm2, %v477_v50, %v481_v35  ;;  %v156_v59 = vrot.slane %v154_v47, 5  ;;  %v161_v60 = vrot.slane %v159_v52, 4  ;;  %v168_v61 = vshll.u32 %v92_v45, 16  ;;  %v2319_v2 = vld [vmem:[%s3588_s0 + $0x24] sm:$0x1]  ;;  %s2639_s20 = smov 56  }
   0xe   :  { %333 = vrot.lane.b32.xlu0 %v2284_v48, %s2629_s23  ;;  %v496_v63 = vsel %vm2696_vm2, %v491_v54, %v495_v41  ;;  %v151_v0 = vor.u32 %v150_v55, %v147_v51  ;;  %v164_v1 = vrot.slane %v162_v56, 5  ;;  %v498_v3 = vshrl.u32 %v2316_v53, 16  ;;  %v93_v4 = vld [vmem:[%s3588_s0 + $0x20] sm:$0xf]  ;;  %v94_v10 = vld [vmem:[%s3588_s0 + $0x24] sm:$0x1] }
   0xf   :  { %v2340_v5 = vcombine.low %v482_v58, %v496_v63  ;;  %v170_v6 = vrot.slane %v168_v61, 5  ;;  %v2592_v7 = vld [vmem:[%s3588_s0 + $0x18] ss:$8 sps:$4 sm:$0xff]   ;;  %v501_v8 = vshll.u32 %v2316_v53, 16  ;;  %v507_v9 = vshll.u32 %v2317_v57, 16 }
  0x10   :  { %v152_v11 = vrot.slane %v151_v0, 4  ;;  %v165_v12 = vor.u32 %v164_v1, %v161_v60  ;;  %v500_v13 = vrot.slane %v498_v3, 4  ;;  %v512_v14 = vshrl.u32 %v2318_v62, 16  ;;  %v95_v15 = vld [vmem:[%s3588_s0 + $0x28] sm:$0xf] }
  0x11   :  { %686 = vrot.lane.b32.xlu1 %v2340_v5, %s2631_s12  ;;  %v503_v16 = vrot.slane %v501_v8, 5  ;;  %v509_v17 = vrot.slane %v507_v9, 5  ;;  %v515_v18 = vshll.u32 %v2318_v62, 16  ;;  %v521_v19 = vshll.u32 %v2319_v2, 16  ;;  %v96_v28 = vld [vmem:[%s3588_s0 + $0x2c] sm:$0x1] }
  0x12   :  { %412 = vrot.lane.b32.xlu0 %v2591_v49, %s2630_s11  ;;  %v157_v20 = vsel %vm2696_vm2, %v152_v11, %v156_v59  ;;  %v166_v21 = vrot.slane %v165_v12, 4  ;;  %v514_v22 = vrot.slane %v512_v14, 4  ;;  %v173_v24 = vshrl.u32 %v93_v4, 16  ;;  %v2320_v34 = vld [vmem:[%s3588_s0 + $0x28] sm:$0xf] }
  0x13   :  { %v504_v25 = vor.u32 %v503_v16, %v500_v13  ;;  %v517_v26 = vrot.slane %v515_v18, 5  ;;  %v523_v27 = vrot.slane %v521_v19, 5  ;;  %v176_v29 = vshll.u32 %v93_v4, 16  ;;  %v2321_v39 = vld [vmem:[%s3588_s0 + $0x2c] sm:$0x1] }
  0x14   :  { %v171_v30 = vsel %vm2696_vm2, %v166_v21, %v170_v6  ;;  %v175_v31 = vrot.slane %v173_v24, 4  ;;  %v182_v32 = vshll.u32 %v94_v10, 16  ;;  %v187_v33 = vshrl.u32 %v95_v15, 16  ;;  %v2322_v44 = vld [vmem:[%s3588_s0 + $0x30] sm:$0xf] }
  0x15   :  { %v2285_v35 = vcombine.low %v157_v20, %v171_v30  ;;  %v505_v36 = vrot.slane %v504_v25, 4  ;;  %v518_v37 = vor.u32 %v517_v26, %v514_v22  ;;  %v178_v38 = vrot.slane %v176_v29, 5  ;;  %v2323_v48 = vld [vmem:[%s3588_s0 + $0x34] sm:$0x1]  ;;  %v97_v50 = vld [vmem:[%s3588_s0 + $0x30] sm:$0xf] }
  0x16   :  { %414 = vrot.lane.b32.xlu0 %v2592_v7, %s2630_s11  ;;  %v184_v40 = vrot.slane %v182_v32, 5  ;;  %v189_v41 = vrot.slane %v187_v33, 4  ;;  %v190_v42 = vshll.u32 %v95_v15, 16  ;;  %v196_v43 = vshll.u32 %v96_v28, 16  ;;  %v98_v55 = vld [vmem:[%s3588_s0 + $0x34] sm:$0x1] }
  0x17   :  { %335 = vrot.lane.b32.xlu1 %v2285_v35, %s2629_s23  ;;  %v510_v45 = vsel %vm2696_vm2, %v505_v36, %v509_v17  ;;  %v519_v46 = vrot.slane %v518_v37, 4  ;;  %v179_v47 = vor.u32 %v178_v38, %v175_v31  ;;  %v526_v49 = vshrl.u32 %v2320_v34, 16  ;;  %v99_v60 = vld [vmem:[%s3588_s0 + $0x40] sm:$0xf]  ;;  %v2593_v2 = vld [vmem:[%s3588_s0 + $0x28] ss:$8 sps:$4 sm:$0xff]  }
  0x18   :  { %v192_v51 = vrot.slane %v190_v42, 5  ;;  %v198_v52 = vrot.slane %v196_v43, 5  ;;  %v529_v53 = vshll.u32 %v2320_v34, 16  ;;  %v535_v54 = vshll.u32 %v2321_v39, 16  ;;  %v100_v8 = vld [vmem:[%s3588_s0 + $0x44] sm:$0x1] }
  0x19   :  { %v524_v56 = vsel %vm2696_vm2, %v519_v46, %v523_v27  ;;  %v180_v57 = vrot.slane %v179_v47, 4  ;;  %v528_v58 = vrot.slane %v526_v49, 4  ;;  %v540_v59 = vshrl.u32 %v2322_v44, 16  ;;  %v2324_v15 = vld [vmem:[%s3588_s0 + $0x38] sm:$0xf] }
  0x1a   :  { %v2341_v61 = vcombine.low %v510_v45, %v524_v56  ;;  %v193_v62 = vor.u32 %v192_v51, %v189_v41  ;;  %v531_v63 = vrot.slane %v529_v53, 5  ;;  %v537_v0 = vrot.slane %v535_v54, 5  ;;  %v2325_v20 = vld [vmem:[%s3588_s0 + $0x3c] sm:$0x1]  ;;  %v2326_v26 = vld [vmem:[%s3588_s0 + $0x48] sm:$0xf] }
  0x1b   :  { %v185_v1 = vsel %vm2696_vm2, %v180_v57, %v184_v40  ;;  %v542_v3 = vrot.slane %v540_v59, 4  ;;  %v543_v4 = vshll.u32 %v2322_v44, 16  ;;  %v549_v5 = vshll.u32 %v2323_v48, 16  ;;  %v2327_v31 = vld [vmem:[%s3588_s0 + $0x4c] sm:$0x1] }
  0x1c   :  { %688 = vrot.lane.b32.xlu1 %v2341_v61, %s2631_s12  ;;  %v194_v6 = vrot.slane %v193_v62, 4  ;;  %v532_v7 = vor.u32 %v531_v63, %v528_v58  ;;  %v201_v9 = vshrl.u32 %v97_v50, 16  ;;  %v204_v10 = vshll.u32 %v97_v50, 16  ;;  %v101_v32 = vld [vmem:[%s3588_s0 + $0x48] sm:$0xf] }
  0x1d   :  { %v545_v11 = vrot.slane %v543_v4, 5  ;;  %v551_v12 = vrot.slane %v549_v5, 5  ;;  %v210_v13 = vshll.u32 %v98_v55, 16  ;;  %v215_v14 = vshrl.u32 %v99_v60, 16  ;;  %v102_v37 = vld [vmem:[%s3588_s0 + $0x4c] sm:$0x1] }
  0x1e   :  { %v199_v16 = vsel %vm2696_vm2, %v194_v6, %v198_v52  ;;  %v533_v17 = vrot.slane %v532_v7, 4  ;;  %v203_v18 = vrot.slane %v201_v9, 4  ;;  %v206_v19 = vrot.slane %v204_v10, 5  ;;  %v103_v38 = vld [vmem:[%s3588_s0 + $0x50] sm:$0xf] }
  0x1f   :  { %v2286_v21 = vcombine.low %v185_v1, %v199_v16  ;;  %v546_v22 = vor.u32 %v545_v11, %v542_v3  ;;  %v212_v24 = vrot.slane %v210_v13, 5  ;;  %v217_v25 = vrot.slane %v215_v14, 4  ;;  %v2594_v50 = vld [vmem:[%s3588_s0 + $0x38] ss:$16 sps:$4 sm:$0xff]   ;;  %v104_v55 = vld [vmem:[%s3588_s0 + $0x54] sm:$0x1] }
  0x20   :  { %416 = vrot.lane.b32.xlu1 %v2593_v2, %s2630_s11  ;;  %v538_v27 = vsel %vm2696_vm2, %v533_v17, %v537_v0  ;;  %v207_v28 = vor.u32 %v206_v19, %v203_v18  ;;  %v218_v29 = vshll.u32 %v99_v60, 16  ;;  %v224_v30 = vshll.u32 %v100_v8, 16  ;;  %v2328_v61 = vld [vmem:[%s3588_s0 + $0x50] sm:$0xf]  ;;  %v2329_v2 = vld [vmem:[%s3588_s0 + $0x54] sm:$0x1] }
  0x21   :  { %337 = vrot.lane.b32.xlu0 %v2286_v21, %s2629_s23  ;;  %v547_v33 = vrot.slane %v546_v22, 4  ;;  %v554_v34 = vshrl.u32 %v2324_v15, 16  ;;  %v557_v35 = vshll.u32 %v2324_v15, 16  ;;  %v563_v36 = vshll.u32 %v2325_v20, 16  ;;  %v2330_v7 = vld [vmem:[%s3588_s0 + $0x58] sm:$0xf] }
  0x22   :  { %v208_v39 = vrot.slane %v207_v28, 4  ;;  %v220_v40 = vrot.slane %v218_v29, 5  ;;  %v226_v41 = vrot.slane %v224_v30, 5  ;;  %v568_v42 = vshrl.u32 %v2326_v26, 16  ;;  %v2331_v14 = vld [vmem:[%s3588_s0 + $0x5c] sm:$0x1] }
  0x23   :  { %v552_v43 = vsel %vm2696_vm2, %v547_v33, %v551_v12  ;;  %v556_v44 = vrot.slane %v554_v34, 4  ;;  %v559_v45 = vrot.slane %v557_v35, 5  ;;  %v565_v46 = vrot.slane %v563_v36, 5  ;;  %v105_v17 = vld [vmem:[%s3588_s0 + $0x58] sm:$0xf] }
  0x24   :  { %v2342_v47 = vcombine.low %v538_v27, %v552_v43  ;;  %v213_v48 = vsel %vm2696_vm2, %v208_v39, %v212_v24  ;;  %v221_v49 = vor.u32 %v220_v40, %v217_v25  ;;  %v570_v51 = vrot.slane %v568_v42, 4 }
  0x25   :  { %v560_v52 = vor.u32 %v559_v45, %v556_v44  ;;  %v571_v53 = vshll.u32 %v2326_v26, 16  ;;  %v577_v54 = vshll.u32 %v2327_v31, 16  ;;  %v229_v56 = vshrl.u32 %v101_v32, 16  ;;  %v106_v31 = vld [vmem:[%s3588_s0 + $0x5c] sm:$0x1] }
  0x26   :  { %690 = vrot.lane.b32.xlu0 %v2342_v47, %s2631_s12  ;;  %v222_v57 = vrot.slane %v221_v49, 4  ;;  %v232_v58 = vshll.u32 %v101_v32, 16  ;;  %v238_v59 = vshll.u32 %v102_v37, 16  ;;  %v243_v60 = vshrl.u32 %v103_v38, 16  ;;  %v107_v32 = vld [vmem:[%s3588_s0 + $0x60] sm:$0xf] }
  0x27   :  { %v561_v62 = vrot.slane %v560_v52, 4  ;;  %v573_v63 = vrot.slane %v571_v53, 5  ;;  %v579_v0 = vrot.slane %v577_v54, 5  ;;  %v231_v1 = vrot.slane %v229_v56, 4  ;;  %v108_v44 = vld [vmem:[%s3588_s0 + $0x64] sm:$0x1] }
  0x28   :  { %v227_v3 = vsel %vm2696_vm2, %v222_v57, %v226_v41  ;;  %v234_v4 = vrot.slane %v232_v58, 5  ;;  %v240_v5 = vrot.slane %v238_v59, 5  ;;  %v245_v6 = vrot.slane %v243_v60, 4  ;;  %v2334_v56 = vld [vmem:[%s3588_s0 + $0x68] sm:$0xf] }
  0x29   :  { %v2287_v8 = vcombine.low %v213_v48, %v227_v3  ;;  %v566_v9 = vsel %vm2696_vm2, %v561_v62, %v565_v46  ;;  %v574_v10 = vor.u32 %v573_v63, %v570_v51  ;;  %v246_v11 = vshll.u32 %v103_v38, 16  ;;  %v2595_v38 = vld [vmem:[%s3588_s0 + $0x50] ss:$8 sps:$4 sm:$0xff]   ;;  %v109_v62 = vld [vmem:[%s3588_s0 + $0x68] sm:$0xf] }
  0x2a   :  { %418 = vrot.lane.b32.xlu0 %v2594_v50, %s2630_s11  ;;  %v235_v12 = vor.u32 %v234_v4, %v231_v1  ;;  %v252_v13 = vshll.u32 %v104_v55, 16  ;;  %v582_v15 = vshrl.u32 %v2328_v61, 16  ;;  %v585_v16 = vshll.u32 %v2328_v61, 16  ;;  %v2332_v50 = vld [vmem:[%s3588_s0 + $0x60] sm:$0xf] }
  0x2b   :  { %339 = vrot.lane.b32.xlu1 %v2287_v8, %s2629_s23  ;;  %v575_v18 = vrot.slane %v574_v10, 4  ;;  %v248_v19 = vrot.slane %v246_v11, 5  ;;  %v591_v20 = vshll.u32 %v2329_v2, 16  ;;  %v596_v21 = vshrl.u32 %v2330_v7, 16  ;;  %v2333_v55 = vld [vmem:[%s3588_s0 + $0x64] sm:$0x1] }
  0x2c   :  { %v236_v22 = vrot.slane %v235_v12, 4  ;;  %v254_v24 = vrot.slane %v252_v13, 5  ;;  %v584_v25 = vrot.slane %v582_v15, 4  ;;  %v587_v26 = vrot.slane %v585_v16, 5  ;;  %v2335_v61 = vld [vmem:[%s3588_s0 + $0x6c] sm:$0x1] }
  0x2d   :  { %v580_v27 = vsel %vm2696_vm2, %v575_v18, %v579_v0  ;;  %v249_v28 = vor.u32 %v248_v19, %v245_v6  ;;  %v593_v29 = vrot.slane %v591_v20, 5  ;;  %v598_v30 = vrot.slane %v596_v21, 4  ;;  %v111_v12 = vld [vmem:[%s3588_s0 + $0x70] sm:$0xf]  ;;  %v2596_v16 = vld [vmem:[%s3588_s0 + $0x60] ss:$8 sps:$4 sm:$0xff]  }
  0x2e   :  { %v2343_v33 = vcombine.low %v566_v9, %v580_v27  ;;  %v241_v34 = vsel %vm2696_vm2, %v236_v22, %v240_v5  ;;  %v588_v35 = vor.u32 %v587_v26, %v584_v25  ;;  %v599_v36 = vshll.u32 %v2330_v7, 16  ;;  %v110_v7 = vld [vmem:[%s3588_s0 + $0x6c] sm:$0x1]  ;;  %v112_v21 = vld [vmem:[%s3588_s0 + $0x74] sm:$0x1] }
  0x2f   :  { %v250_v37 = vrot.slane %v249_v28, 4  ;;  %v605_v39 = vshll.u32 %v2331_v14, 16  ;;  %v257_v40 = vshrl.u32 %v105_v17, 16  ;;  %v260_v41 = vshll.u32 %v105_v17, 16 }
  0x30   :  { %692 = vrot.lane.b32.xlu1 %v2343_v33, %s2631_s12  ;;  %v589_v42 = vrot.slane %v588_v35, 4  ;;  %v601_v43 = vrot.slane %v599_v36, 5  ;;  %v266_v45 = vshll.u32 %v106_v31, 16  ;;  %v271_v46 = vshrl.u32 %v107_v32, 16 }
  0x31   :  { %v255_v47 = vsel %vm2696_vm2, %v250_v37, %v254_v24  ;;  %v259_v48 = vrot.slane %v257_v40, 4  ;;  %v262_v49 = vrot.slane %v260_v41, 5  ;;  %v607_v53 = vrot.slane %v605_v39, 5  ;;  %v2336_v24 = vld [vmem:[%s3588_s0 + $0x70] sm:$0xf] }
  0x32   :  { %v2288_v51 = vcombine.low %v241_v34, %v255_v47  ;;  %v602_v52 = vor.u32 %v601_v43, %v598_v30  ;;  %v268_v54 = vrot.slane %v266_v45, 5  ;;  %v273_v58 = vrot.slane %v271_v46, 4  ;;  %v2339_v45 = vld [vmem:[%s3588_s0 + $0x7c] sm:$0x1] }
  0x33   :  { %v263_v57 = vor.u32 %v262_v49, %v259_v48  ;;  %v274_v59 = vshll.u32 %v107_v32, 16  ;;  %v280_v60 = vshll.u32 %v108_v44, 16  ;;  %v594_v63 = vsel %vm2696_vm2, %v589_v42, %v593_v29  ;;  %v2338_v29 = vld [vmem:[%s3588_s0 + $0x78] sm:$0xf]  ;;  %v2337_v42 = vld [vmem:[%s3588_s0 + $0x74] sm:$0x1] }
  0x34   :  { %341 = vrot.lane.b32.xlu0 %v2288_v51, %s2629_s23  ;;  %420 = vrot.lane.b32.xlu1 %v2595_v38, %s2630_s11  ;;  %v603_v0 = vrot.slane %v602_v52, 4  ;;  %v610_v1 = vshrl.u32 %v2332_v50, 16  ;;  %v613_v2 = vshll.u32 %v2332_v50, 16  ;;  %v619_v5 = vshll.u32 %v2333_v55, 16  ;;  %v2599_v48 = vld [vmem:[%s3588_s0] ss:$8 sps:$4 sm:$0xff]  }
  0x35   :  { %v264_v3 = vrot.slane %v263_v57, 4  ;;  %v276_v4 = vrot.slane %v274_v59, 5  ;;  %v624_v6 = vshrl.u32 %v2334_v56, 16  ;;  %v282_v9 = vrot.slane %v280_v60, 5 }
  0x36   :  { %v608_v8 = vsel %vm2696_vm2, %v603_v0, %v607_v53  ;;  %v612_v10 = vrot.slane %v610_v1, 4  ;;  %v615_v11 = vrot.slane %v613_v2, 5  ;;  %v627_v19 = vshll.u32 %v2334_v56, 16  ;;  %v2598_v53 = vld [vmem:[%s3589_s1] sm:$0xff]   ;;  %v2597_v0 = vld [vmem:[%s3588_s0 + $0x70] ss:$8 sps:$4 sm:$0xff]  }
  0x37   :  { %v2344_v13 = vcombine.low %v594_v63, %v608_v8  ;;  %v269_v14 = vsel %vm2696_vm2, %v264_v3, %v268_v54  ;;  %v277_v15 = vor.u32 %v276_v4, %v273_v58  ;;  %v626_v17 = vrot.slane %v624_v6, 4  ;;  %v2602_v3 = vld [vmem:[%s3588_s0 + $0x10] ss:$8 sps:$4 sm:$0xff]  }
  0x38   :  { %v616_v18 = vor.u32 %v615_v11, %v612_v10  ;;  %v633_v20 = vshll.u32 %v2335_v61, 16  ;;  %v285_v22 = vshrl.u32 %v109_v62, 16  ;;  %v288_v26 = vshll.u32 %v109_v62, 16  ;;  %v2600_v11 = vld [vmem:[%s3589_s1 + $0x8] sm:$0xff]  }
  0x39   :  { %694 = vrot.lane.b32.xlu0 %v2344_v13, %s2631_s12  ;;  %v278_v25 = vrot.slane %v277_v15, 4  ;;  %v294_v27 = vshll.u32 %v110_v7, 16  ;;  %v299_v28 = vshrl.u32 %v111_v12, 16  ;;  %v621_v31 = vrot.slane %v619_v5, 5  ;;  %v2604_v15 = vld [vmem:[%s3588_s0 + $0x20] ss:$8 sps:$4 sm:$0xff]  }
  0x3a   :  { %v617_v30 = vrot.slane %v616_v18, 4  ;;  %v629_v32 = vrot.slane %v627_v19, 5  ;;  %v287_v33 = vrot.slane %v285_v22, 4  ;;  %v635_v35 = vrot.slane %v633_v20, 5  ;;  %v2606_v20 = vld [vmem:[%s3588_s0 + $0x48] ss:$8 sps:$4 sm:$0xff]  }
  0x3b   :  { %v283_v34 = vsel %vm2696_vm2, %v278_v25, %v282_v9  ;;  %v290_v36 = vrot.slane %v288_v26, 5  ;;  %v296_v37 = vrot.slane %v294_v27, 5  ;;  %v301_v40 = vrot.slane %v299_v28, 4  ;;  %v2607_v22 = vld [vmem:[%s3588_s0 + $0x58] ss:$8 sps:$4 sm:$0xff]  }
  0x3c   :  { %v2289_v38 = vcombine.low %v269_v14, %v283_v34  ;;  %v630_v39 = vor.u32 %v629_v32, %v626_v17  ;;  %v302_v41 = vshll.u32 %v111_v12, 16  ;;  %v308_v44 = vshll.u32 %v112_v21, 16  ;;  %v2605_v17 = vld [vmem:[%s3588_s0 + $0x30] ss:$16 sps:$4 sm:$0xff]   ;;  %v2603_v26 = vld [vmem:[%s3589_s1 + $0x18] sm:$0xff]  }
  0x3d   :  { %422 = vrot.lane.b32.xlu0 %v2596_v16, %s2630_s11  ;;  %v291_v43 = vor.u32 %v290_v36, %v287_v33  ;;  %v638_v46 = vshrl.u32 %v2336_v24, 16  ;;  %v641_v47 = vshll.u32 %v2336_v24, 16  ;;  %v622_v49 = vsel %vm2696_vm2, %v617_v30, %v621_v31  ;;  %v2601_v16 = vld [vmem:[%s3589_s1 + $0x10] sm:$0xff]  }
  0x3e   :  { %343 = vrot.lane.b32.xlu1 %v2289_v38, %s2629_s23  ;;  %v631_v50 = vrot.slane %v630_v39, 4  ;;  %v304_v51 = vrot.slane %v302_v41, 5  ;;  %v652_v52 = vshrl.u32 %v2338_v29, 16  ;;  %v647_v57 = vshll.u32 %v2337_v42, 16  ;;  %v2608_v25 = vld [vmem:[%s3588_s0 + $0x68] ss:$8 sps:$4 sm:$0xff]  }
  0x3f   :  { %v292_v54 = vrot.slane %v291_v43, 4  ;;  %v640_v55 = vrot.slane %v638_v46, 4  ;;  %v643_v56 = vrot.slane %v641_v47, 5  ;;  %v310_v60 = vrot.slane %v308_v44, 5 }
  0x40   :  { %v636_v58 = vsel %vm2696_vm2, %v631_v50, %v635_v35  ;;  %v305_v59 = vor.u32 %v304_v51, %v301_v40  ;;  %v654_v61 = vrot.slane %v652_v52, 4  ;;  %v655_v2 = vshll.u32 %v2338_v29, 16 }
  0x41   :  { %v2345_v62 = vcombine.low %v622_v49, %v636_v58  ;;  %v297_v63 = vsel %vm2696_vm2, %v292_v54, %v296_v37  ;;  %v644_v1 = vor.u32 %v643_v56, %v640_v55  ;;  %v661_v5 = vshll.u32 %v2339_v45, 16 }
  0x42   :  { %v306_v4 = vrot.slane %v305_v59, 4  ;;  %vm77_vm3 = vcmask 130048   ;;  %v649_v7 = vrot.slane %v647_v57, 5  ;;  %v657_v8 = vrot.slane %v655_v2, 5 }
  0x43   :  { %696 = vrot.lane.b32.xlu1 %v2345_v62, %s2631_s12  ;;  %v645_v6 = vrot.slane %v644_v1, 4  ;;  %v3594_v9 = vmov 0.0   ;;  %78 = vst.msk [vmem:[#allocation2] sm:$0xff] %vm77_vm3, %v2599_v48  ;;  %79 = vst.msk [vmem:[#allocation2 + $0x8] sm:$0xff] %vm77_vm3, %v2602_v3  ;;  %v663_v14 = vrot.slane %v661_v5, 5  ;;  %vm2633_vm4 = vmmov 0  }
  0x44   :  { %2514 = vmatprep.subr.bf16.mxu0 %v3594_v9  ;;  %v311_v10 = vsel %vm2696_vm2, %v306_v4, %v310_v60  ;;  %2550 = vmatprep.subr.bf16.mxu1 %v3594_v9  ;;  %v658_v13 = vor.u32 %v657_v8, %v654_v61  ;;  %80 = vst.msk [vmem:[#allocation2 + $0x10] sm:$0xff] %vm77_vm3, %v2604_v15  ;;  %81 = vst.msk [vmem:[#allocation2 + $0x18] sm:$0xff] %vm77_vm3, %v2605_v17  ;;  %vm354_vm5 = vcmask 261248   ;;  %vm433_vm6 = vcmask 392448  }
  0x45   :  { %2515 = vmatpush3.bf16.msra.mxu0 %v2598_v53  ;;  %v2290_v12 = vcombine.low %v297_v63, %v311_v10  ;;  %2522 = vmatprep.mubr.msk.bf16.mxu0 %vm2633_vm4, %v3594_v9  ;;  %v650_v18 = vsel %vm2696_vm2, %v645_v6, %v649_v7  ;;  %82 = vst.msk [vmem:[#allocation2 + $0x20] sm:$0xff] %vm77_vm3, %v2606_v20  ;;  %83 = vst.msk [vmem:[#allocation2 + $0x28] sm:$0xff] %vm77_vm3, %v2607_v22  ;;  %vm707_vm7 = vcmask 523648   ;;  %vm761_vm8 = vcmask 523264  }
  0x46   :  { %2516 = vmatprep.subr.bf16.mxu0 %v3594_v9  ;;  %2560 = vmatprep.mubr.msk.bf16.mxu1 %vm2633_vm4, %v3594_v9  ;;  %v659_v19 = vrot.slane %v658_v13, 4  ;;  %84 = vst.msk [vmem:[#allocation2 + $0x30] sm:$0xff] %vm77_vm3, %v2608_v25  ;;  %vm957_vm9 = vcmask 57344   ;;  %v2634_v55 = vmov 0   ;;  %vm942_vm10 = vcmask 60416  }
  0x47   :  { %345 = vrot.lane.b32.xlu0 %v2290_v12, %s2629_s23  ;;  %424 = vrot.lane.b32.xlu1 %v2597_v0, %s2630_s11  ;;  %958 = vst.msk [vmem:[#allocation3 + $0x4] sm:$0x1] %vm957_vm9, %v2634_v55  ;;  %959 = vst.msk [vmem:[#allocation3 + $0xc] sm:$0x1] %vm957_vm9, %v2634_v55  ;;  %vm1254_vm11 = vcmask 1042432   ;;  %vm1255_vm12 = vcmask 1046532  }
  0x48   :  { %v664_v21 = vsel %vm2696_vm2, %v659_v19, %v663_v14  ;;  %960 = vst.msk [vmem:[#allocation3 + $0x14] sm:$0x1] %vm957_vm9, %v2634_v55  ;;  %961 = vst.msk [vmem:[#allocation3 + $0x1c] sm:$0x1] %vm957_vm9, %v2634_v55  ;;  %vm1012_vm13 = vcmask 64512   ;;  %vm2135_vm15 = vcmask 1043456  }
  0x49   :  { %2517 = vmatpush3.bf16.msra.mxu0 %v2600_v11  ;;  %v2346_v24 = vcombine.low %v650_v18, %v664_v21  ;;  %962 = vst.msk [vmem:[#allocation3 + $0x24] sm:$0x1] %vm957_vm9, %v2634_v55  ;;  %963 = vst.msk [vmem:[#allocation3 + $0x2c] sm:$0x1] %vm957_vm9, %v2634_v55  ;;  %vm1208_vm0 = vcmask 130112   ;;  %vm1327_vm1 = vcmask 195712  }
  0x4a   :  { %2518 = vmatprep.subr.bf16.mxu0 %v3594_v9  ;;  %964 = vst.msk [vmem:[#allocation3 + $0x34] sm:$0x1] %vm957_vm9, %v2634_v55  ;;  %965 = vst.msk [vmem:[#allocation3 + $0x3c] sm:$0x1] %vm957_vm9, %v2634_v55  ;;  %vm1384_vm3 = vcmask 261312  }
  0x4b   :  { %698 = vrot.lane.b32.xlu0 %v2346_v24, %s2631_s12  ;;  %966 = vst.msk [vmem:[#allocation3 + $0x44] sm:$0x1] %vm957_vm9, %v2634_v55  ;;  %967 = vst.msk [vmem:[#allocation3 + $0x4c] sm:$0x1] %vm957_vm9, %v2634_v55 }
  0x4c   :  { %968 = vst.msk [vmem:[#allocation3 + $0x54] sm:$0x1] %vm957_vm9, %v2634_v55  ;;  %969 = vst.msk [vmem:[#allocation3 + $0x5c] sm:$0x1] %vm957_vm9, %v2634_v55 }
  0x4d   :  { %2519 = vmatpush3.bf16.msra.mxu0 %v2601_v16  ;;  %970 = vst.msk [vmem:[#allocation3 + $0x64] sm:$0x1] %vm957_vm9, %v2634_v55  ;;  %971 = vst.msk [vmem:[#allocation3 + $0x6c] sm:$0x1] %vm957_vm9, %v2634_v55  ;;  %vm2119_vm9 = vcmask 588800  }
  0x4e   :  { %2520 = vmatprep.subr.bf16.mxu0 %v3594_v9  ;;  %v3031_v56 = vld [vmem:[#allocation3 + $0x4] sm:$0x1]  ;;  %v1021_v58 = vld [vmem:[#allocation3 + $0xc] sm:$0x1]  ;;  %vm3182_vm14 = vmor %vm1254_vm11, %vm1255_vm12 }
  0x4f   :  { %v1019_v57 = vld [vmem:[#allocation3 + $0x4] sm:$0x1]  ;;  %v1391_v59 = vld [vmem:[#allocation3 + $0xc] sm:$0x1]  ;;  %v1062_v0 = vshll.u32 %v1021_v58, 16 }
  0x50   :  { %v3033_v60 = vld [vmem:[#allocation3 + $0xc] sm:$0x1]  ;;  %v1048_v63 = vshll.u32 %v1019_v57, 16  ;;  %v1393_v1 = vld [vmem:[#allocation3 + $0x14] sm:$0x1]  ;;  %v1420_v2 = vshll.u32 %v1391_v59, 16 }
  0x51   :  { %2521 = vmatpush3.bf16.msra.mxu0 %v2603_v26  ;;  %v3035_v61 = vld [vmem:[#allocation3 + $0xc] sm:$0x1]  ;;  %v3038_v3 = vld [vmem:[#allocation3 + $0x14] sm:$0x1]  ;;  %v3044_v6 = vld [vmem:[#allocation3 + $0x1c] sm:$0x1] }
  0x52   :  { %v3040_v4 = vld [vmem:[#allocation3 + $0x14] sm:$0x1]  ;;  %v3046_v7 = vld [vmem:[#allocation3 + $0x1c] sm:$0x1]  ;;  %v1434_v11 = vshll.u32 %v1393_v1, 16  ;;  %v3049_v14 = vrot.slane %v1048_v63, 5 }
  0x53   :  { %v3042_v5 = vld [vmem:[#allocation3 + $0x14] sm:$0x1]  ;;  %v1762_v12 = vld [vmem:[#allocation3 + $0x1c] sm:$0x1]  ;;  %v3051_v15 = vrot.slane %v1062_v0, 5  ;;  %v3057_v21 = vrot.slane %v1420_v2, 5 }
  0x54   :  { %v1760_v8 = vld [vmem:[#allocation3 + $0x14] sm:$0x1]  ;;  %v1025_v18 = vld [vmem:[#allocation3 + $0x1c] sm:$0x1]  ;;  %v1803_v26 = vshll.u32 %v1762_v12, 16 }
  0x55   :  { %v1023_v13 = vld [vmem:[#allocation3 + $0x14] sm:$0x1]  ;;  %v1789_v22 = vshll.u32 %v1760_v8, 16  ;;  %v3089_v55 = vld [vmem:[#allocation3 + $0x3c] sm:$0x1] }
  0x56   :  { %v1399_v58 = vld [vmem:[#allocation3 + $0x2c] sm:$0x1]  ;;  %v1401_v0 = vld [vmem:[#allocation3 + $0x44] sm:$0x1]  ;;  %v1768_v1 = vld [vmem:[#allocation3 + $0x34] sm:$0x1] }
  0x57   :  { %v3097_v2 = vld [vmem:[%s3590_s2] ss:$0 sm:$0xff]  ;;  %v1037_v19 = vld [vmem:[#allocation3 + $0x5c] sm:$0x1] }
  0x58   :  { %v3147_v16 = vld [vmem:[#allocation3 + $0x5c] sm:$0x1] }
  0x59   :  { %3614 = vst [vmem:[#allocation12_spill] sm:$0xff] %v3147_v16 }
  0x80   :  { %v334_v27 = vpop.permute.xlu0 %333 }
  0x81   :  { %355 = vst.msk [vmem:[#allocation2] sm:$0xff] %vm354_vm5, %v334_v27  ;;  %v1076_v27 = vshll.u32 %v1023_v13, 16 }
  0x83   :  { %v687_v29 = vpop.permute.xlu1 %686 }
  0x84   :  { %v413_v28 = vpop.permute.xlu0 %412 }
  0x85   :  { %434 = vst.msk [vmem:[#allocation2] sm:$0xff] %vm433_vm6, %v413_v28  ;;  %v1395_v28 = vld [vmem:[#allocation3 + $0x1c] sm:$0x1] }
  0x86   :  { %708 = vst.msk [vmem:[#allocation2] sm:$0xff] %vm707_vm7, %v687_v29  ;;  %v3061_v29 = vrot.slane %v1434_v11, 5 }
  0x88   :  { %v415_v30 = vpop.permute.xlu0 %414 }
  0x89   :  { %v336_v31 = vpop.permute.xlu1 %335 }
  0x8a   :  { %356 = vst.msk [vmem:[#allocation2 + $0x8] sm:$0xff] %vm354_vm5, %v336_v31  ;;  %v3063_v31 = vld [vmem:[#allocation3 + $0x1c] sm:$0x1] }
  0x8b   :  { %435 = vst.msk [vmem:[#allocation2 + $0x8] sm:$0xff] %vm433_vm6, %v415_v30  ;;  %v1090_v30 = vshll.u32 %v1025_v18, 16  ;;  %v1770_v18 = vld [vmem:[#allocation3 + $0x4c] sm:$0x1] }
  0x8d   :  { %v715_v32 = vld [vmem:[#allocation2] sm:$0xff] }
  0x8e   :  { %2523 = vmatmul.mubr.msk.bf16.vlgmr.msra.gmra.mrb[0].mxu0 %vm761_vm8, %v715_v32  ;;  %v689_v33 = vpop.permute.xlu1 %688  ;;  %v1397_v32 = vld [vmem:[#allocation3 + $0x24] sm:$0x1] }
  0x8f   :  { %2526 = vmatprep.mubr.msk.bf16.mxu0 %vm2633_vm4, %v3594_v9  ;;  %709 = vst.msk [vmem:[#allocation2 + $0x8] sm:$0xff] %vm707_vm7, %v689_v33  ;;  %v3065_v33 = vld [vmem:[#allocation3 + $0x24] sm:$0x1] }
  0x92   :  { %v417_v34 = vpop.permute.xlu1 %416 }
  0x93   :  { %v338_v35 = vpop.permute.xlu0 %337 }
  0x94   :  { %357 = vst.msk [vmem:[#allocation2 + $0x10] sm:$0xff] %vm354_vm5, %v338_v35  ;;  %v1766_v35 = vld [vmem:[#allocation3 + $0x2c] sm:$0x1] }
  0x95   :  { %436 = vst.msk [vmem:[#allocation2 + $0x10] sm:$0xff] %vm433_vm6, %v417_v34  ;;  %v1764_v34 = vld [vmem:[#allocation3 + $0x24] sm:$0x1] }
  0x96   :  { %v716_v36 = vld [vmem:[#allocation2 + $0x8] sm:$0xff] }
  0x97   :  { %2527 = vmatmul.mubr.msk.bf16.gmra.mrb[4].mxu0 %vm761_vm8, %v716_v36  ;;  %v3067_v36 = vrot.slane %v1789_v22, 5 }
  0x98   :  { %v691_v37 = vpop.permute.xlu0 %690  ;;  %2530 = vmatprep.mubr.msk.bf16.mxu0 %vm2633_vm4, %v3594_v9 }
  0x99   :  { %710 = vst.msk [vmem:[#allocation2 + $0x10] sm:$0xff] %vm707_vm7, %v691_v37  ;;  %v3069_v37 = vld [vmem:[#allocation3 + $0x2c] sm:$0x1] }
  0x9c   :  { %v419_v38 = vpop.permute.xlu0 %418 }
  0x9d   :  { %v340_v39 = vpop.permute.xlu1 %339 }
  0x9e   :  { %358 = vst.msk [vmem:[#allocation2 + $0x18] sm:$0xff] %vm354_vm5, %v340_v39  ;;  %v1448_v39 = vshll.u32 %v1395_v28, 16  ;;  %v1476_v28 = vshll.u32 %v1399_v58, 16  ;;  %v1033_v58 = vld [vmem:[#allocation3 + $0x4c] sm:$0x1] }
  0x9f   :  { %437 = vst.msk [vmem:[#allocation2 + $0x18] sm:$0xff] %vm433_vm6, %v419_v38  ;;  %v3071_v38 = vld [vmem:[#allocation3 + $0x24] sm:$0x1] }
  0xa0   :  { %v717_v40 = vld [vmem:[#allocation2 + $0x10] sm:$0xff] }
  0xa1   :  { %2531 = vmatmul.mubr.msk.bf16.gmra.mrb[8].mxu0 %vm761_vm8, %v717_v40  ;;  %v3073_v40 = vrot.slane %v1803_v26, 5  ;;  %v3105_v26 = vld [vmem:[#allocation3 + $0x34] sm:$0x1] }
  0xa2   :  { %v693_v41 = vpop.permute.xlu1 %692  ;;  %2534 = vmatprep.mubr.msk.bf16.mxu0 %vm2633_vm4, %v3594_v9 }
  0xa3   :  { %711 = vst.msk [vmem:[#allocation2 + $0x18] sm:$0xff] %vm707_vm7, %v693_v41  ;;  %v3075_v41 = vrot.slane %v1076_v27, 5  ;;  %v3107_v27 = vld [vmem:[#allocation3 + $0x4c] sm:$0x1] }
  0xa6   :  { %v342_v42 = vpop.permute.xlu0 %341  ;;  %v421_v43 = vpop.permute.xlu1 %420 }
  0xa7   :  { %359 = vst.msk [vmem:[#allocation2 + $0x20] sm:$0xff] %vm354_vm5, %v342_v42 }
  0xa8   :  { %438 = vst.msk [vmem:[#allocation2 + $0x20] sm:$0xff] %vm433_vm6, %v421_v43  ;;  %v1462_v43 = vshll.u32 %v1397_v32, 16  ;;  %v1490_v32 = vshll.u32 %v1401_v0, 16 }
  0xaa   :  { %v718_v44 = vld [vmem:[#allocation2 + $0x18] sm:$0xff]  ;;  %v3092_v59 = vrot.slane %v1462_v43, 5 }
  0xab   :  { %v695_v45 = vpop.permute.xlu0 %694  ;;  %2535 = vmatmul.mubr.msk.bf16.gmra.mrb[12].mxu0 %vm761_vm8, %v718_v44  ;;  %v3078_v44 = vld [vmem:[#allocation3 + $0x24] sm:$0x1] }
  0xac   :  { %712 = vst.msk [vmem:[#allocation2 + $0x20] sm:$0xff] %vm707_vm7, %v695_v45  ;;  %2538 = vmatprep.mubr.msk.bf16.mxu0 %vm2633_vm4, %v3594_v9  ;;  %v3080_v45 = vrot.slane %v1090_v30, 5  ;;  %v3109_v30 = vld [vmem:[#allocation3 + $0x44] sm:$0x1] }
  0xad   :  { %v3113_v43 = vld [vmem:[#allocation3 + $0x44] sm:$0x1] }
  0xaf   :  { %v423_v46 = vpop.permute.xlu0 %422 }
  0xb0   :  { %v344_v47 = vpop.permute.xlu1 %343 }
  0xb1   :  { %360 = vst.msk [vmem:[#allocation2 + $0x28] sm:$0xff] %vm354_vm5, %v344_v47  ;;  %v1817_v47 = vshll.u32 %v1764_v34, 16  ;;  %v1845_v34 = vshll.u32 %v1768_v1, 16  ;;  %v3134_v1 = vld [vmem:[#allocation3 + $0x54] sm:$0x1] }
  0xb2   :  { %439 = vst.msk [vmem:[#allocation2 + $0x28] sm:$0xff] %vm433_vm6, %v423_v46  ;;  %3608 = vst [vmem:[#allocation6_spill] sm:$0xff] %v3134_v1 }
  0xb3   :  { %v719_v48 = vld [vmem:[#allocation2 + $0x20] sm:$0xff]  ;;  %v3099_v8 = vrot.slane %v1817_v47, 5  ;;  %v3129_v46 = vrot.slane %v1845_v34, 5  ;;  %v3138_v34 = vld [vmem:[#allocation3 + $0x5c] sm:$0x1] }
  0xb4   :  { %2539 = vmatmul.mubr.msk.bf16.gmra.mrb[16].mxu0 %vm761_vm8, %v719_v48  ;;  %v1831_v48 = vshll.u32 %v1766_v35, 16  ;;  %v1031_v35 = vld [vmem:[#allocation3 + $0x44] sm:$0x1]  ;;  %v3115_v47 = vld [vmem:[#allocation3 + $0x4c] sm:$0x1]  ;;  %3610 = vst [vmem:[#allocation8_spill] sm:$0xff] %v3138_v34 }
  0xb5   :  { %v697_v49 = vpop.permute.xlu1 %696  ;;  %2542 = vmatprep.mubr.msk.bf16.mxu0 %vm2633_vm4, %v3594_v9  ;;  %3606 = vst [vmem:[#allocation4_spill] sm:$0xff] %v3129_v46  ;;  %v3154_v46 = vld [vmem:[#allocation3 + $0x5c] sm:$0x1] }
  0xb6   :  { %713 = vst.msk [vmem:[#allocation2 + $0x28] sm:$0xff] %vm707_vm7, %v697_v49  ;;  %v1027_v49 = vld [vmem:[#allocation3 + $0x24] sm:$0x1]  ;;  %v3101_v11 = vrot.slane %v1831_v48, 5  ;;  %v1859_v48 = vshll.u32 %v1770_v18, 16  ;;  %3616 = vst [vmem:[#allocation14_spill] sm:$0xff] %v3154_v46 }
  0xb7   :  { %v1104_v63 = vshll.u32 %v1027_v49, 16 }
  0xb9   :  { %v346_v50 = vpop.permute.xlu0 %345  ;;  %v425_v51 = vpop.permute.xlu1 %424 }
  0xba   :  { %361 = vst.msk [vmem:[#allocation2 + $0x30] sm:$0xff] %vm354_vm5, %v346_v50  ;;  %v1772_v50 = vld [vmem:[#allocation3 + $0x54] sm:$0x1]  ;;  %vm1696_vm5 = vcmask 392512  }
  0xbb   :  { %440 = vst.msk [vmem:[#allocation2 + $0x30] sm:$0xff] %vm433_vm6, %v425_v51  ;;  %v1132_v51 = vshll.u32 %v1031_v35, 16  ;;  %v1405_v35 = vld [vmem:[#allocation3 + $0x54] sm:$0x1]  ;;  %vm1753_vm6 = vcmask 458112  }
  0xbd   :  { %v720_v52 = vld [vmem:[#allocation2 + $0x28] sm:$0xff]  ;;  %v699_v53 = vpop.permute.xlu0 %698 }
  0xbe   :  { %2543 = vmatmul.mubr.msk.bf16.gmra.mrb[20].mxu0 %vm761_vm8, %v720_v52  ;;  %714 = vst.msk [vmem:[#allocation2 + $0x30] sm:$0xff] %vm707_vm7, %v699_v53  ;;  %v1029_v52 = vld [vmem:[#allocation3 + $0x3c] sm:$0x1]  ;;  %v3085_v53 = vld [vmem:[#allocation3 + $0x2c] sm:$0x1]  ;;  %vm1949_vm7 = vcmask 523712  }
  0xbf   :  { %2546 = vmatprep.mubr.msk.bf16.mxu0 %vm2633_vm4, %v3594_v9  ;;  %v1118_v12 = vshll.u32 %v1029_v52, 16 }
  0xc1   :  { %v3117_v52 = vrot.slane %v1118_v12, 5  ;;  %v3127_v12 = vrot.slane %v1490_v32, 5  ;;  %v3136_v32 = vrot.slane %v1132_v51, 5  ;;  %v1873_v51 = vshll.u32 %v1772_v50, 16 }
  0xc3   :  { %3609 = vst [vmem:[#allocation7_spill] sm:$0xff] %v3136_v32 }
  0xc5   :  { %v721_v54 = vld [vmem:[#allocation2 + $0x30] sm:$0xff] }
  0xc6   :  { %2547 = vmatmul.mubr.msk.bf16.gmra.mrb[24].mxu0 %vm761_vm8, %v721_v54  ;;  %v3087_v54 = vrot.slane %v1448_v39, 5  ;;  %v3111_v39 = vrot.slane %v1104_v63, 5  ;;  %v3123_v63 = vrot.slane %v1476_v28, 5  ;;  %v1403_v28 = vld [vmem:[#allocation3 + $0x4c] sm:$0x1]  ;;  %vm2065_vm8 = vcmask 589312  }
 0x161   :  { %v817_v49 = vpop.f32.mrb[0].mxu0 }
 0x162   :  { %v818_v57 = vadd.f32 %v3097_v2, %v817_v49  ;;  %v2524_v0 = vpop.f32.mrb[1].mxu0  ;;  %v3132_v49 = vrot.slane %v1859_v48, 5  ;;  %v3144_v48 = vld [vmem:[#allocation3 + $0x54] sm:$0x1] }
 0x163   :  { %v820_v42 = vpop.f32.mrb[2].mxu0  ;;  %v1146_v0 = vshll.u32 %v1033_v58, 16  ;;  %3613 = vst [vmem:[#allocation11_spill] sm:$0xff] %v3144_v48  ;;  %v1035_v58 = vld [vmem:[#allocation3 + $0x54] sm:$0x1] }
 0x164   :  { %v872_v13 = vmax.f32 %v818_v57, 0.0  ;;  %v821_v22 = vadd.f32 %v3097_v2, %v820_v42  ;;  %v2525_v20 = vpop.f32.mrb[3].mxu0  ;;  %3607 = vst [vmem:[#allocation5_spill] sm:$0xff] %v3132_v49  ;;  %v3140_v57 = vld [vmem:[#allocation3 + $0x4c] sm:$0x1]  ;;  %v1160_v32 = vshll.u32 %v1035_v58, 16 }
 0x165   :  { %3611 = vst [vmem:[#allocation9_spill] sm:$0xff] %v3140_v57  ;;  %v3142_v42 = vld [vmem:[#allocation3 + $0x54] sm:$0x1]  ;;  %v1774_v20 = vld [vmem:[#allocation3 + $0x5c] sm:$0x1]  ;;  %v3149_v17 = vrot.slane %v1146_v0, 5 }
 0x166   :  { %v2469_v25 = vpack.c.bf16 %v872_v13, %v872_v13  ;;  %v873_v18 = vmax.f32 %v821_v22, 0.0  ;;  %3612 = vst [vmem:[#allocation10_spill] sm:$0xff] %v3142_v42  ;;  %v1504_v13 = vshll.u32 %v1403_v28, 16  ;;  %v1518_v22 = vshll.u32 %v1405_v35, 16  ;;  %v1407_v28 = vld [vmem:[#allocation3 + $0x5c] sm:$0x1] }
 0x167   :  { %3615 = vst [vmem:[#allocation13_spill] sm:$0xff] %v3149_v17  ;;  %v1887_v62 = vshll.u32 %v1774_v20, 16  ;;  %v1174_v49 = vshll.u32 %v1037_v19, 16  ;;  %v3167_v58 = vrot.slane %v1873_v51, 5  ;;  %v1532_v46 = vshll.u32 %v1407_v28, 16 }
 0x168   :  { %943 = vst.msk [vmem:[#allocation3] sm:$0xf] %vm942_vm10, %v2469_v25  ;;  %v2470_v24 = vpack.c.bf16 %v873_v18, %v873_v18  ;;  %v3156_v25 = vld [vmem:[#allocation3 + $0x64] sm:$0x1]  ;;  %v3165_v19 = vrot.slane %v1518_v22, 5 }
 0x169   :  { %3617 = vst [vmem:[#allocation15_spill] sm:$0xff] %v3156_v25  ;;  %3620 = vst [vmem:[#allocation18_spill] sm:$0xff] %v3167_v58  ;;  %v3169_v17 = vrot.slane %v1887_v62, 5  ;;  %v3198_v1 = vrot.slane %v1532_v46, 5  ;;  %v2621_v46 = vld [vmem:[%s3591_s3 + $0x8] sm:$0xff]  }
 0x16a   :  { %944 = vst.msk [vmem:[#allocation3 + $0x8] sm:$0xf] %vm942_vm10, %v2470_v24  ;;  %v825_v18 = vpop.f32.mrb[4].mxu0  ;;  %v3163_v24 = vrot.slane %v1504_v13, 5  ;;  %3619 = vst [vmem:[#allocation17_spill] sm:$0xff] %v3165_v19  ;;  %v3626_v19 = vrot.slane %v3031_v56, 5 }
 0x16b   :  { %v826_v20 = vadd.f32 %v3097_v2, %v825_v18  ;;  %v2528_v10 = vpop.f32.mrb[5].mxu0  ;;  %3621 = vst [vmem:[#allocation19_spill] sm:$0xff] %v3169_v17  ;;  %v3174_v18 = vrot.slane %v1160_v32, 5  ;;  %v3178_v13 = vld [vmem:[#allocation3 + $0x64] sm:$0x1] }
 0x16c   :  { %3618 = vst [vmem:[#allocation16_spill] sm:$0xff] %v3163_v24  ;;  %v828_v9 = vpop.f32.mrb[6].mxu0  ;;  %v3176_v10 = vrot.slane %v1174_v49, 5  ;;  %v3627_v24 = vrot.slane %v3033_v60, 5  ;;  %v2620_v60 = vld [vmem:[%s3591_s3] sm:$0xff]  }
 0x16d   :  { %v874_v48 = vmax.f32 %v826_v20, 0.0  ;;  %v829_v35 = vadd.f32 %v3097_v2, %v828_v9  ;;  %v2529_v16 = vpop.f32.mrb[7].mxu0  ;;  %3622 = vst [vmem:[#allocation20_spill] sm:$0xff] %v3174_v18  ;;  %2551 = vmatpush3.bf16.msra.mxu1 %v2620_v60 }
 0x16e   :  { %3623 = vst [vmem:[#allocation21_spill] sm:$0xff] %v3176_v10 }
 0x16f   :  { %v1214_v22 = vld [vmem:[#allocation3] sm:$0xe]  ;;  %v2471_v58 = vpack.c.bf16 %v874_v48, %v874_v48  ;;  %v875_v62 = vmax.f32 %v829_v35, 0.0 }
 0x170   :  { %v1018_v51 = vld [vmem:[#allocation3] sm:$0xf]  ;;  %v2383_v20 = vrot.slane %v1214_v22, 9 }
 0x171   :  { %v1039_v0 = vshrl.u32 %v1018_v51, 16  ;;  %v1216_v9 = vld [vmem:[#allocation3 + $0x8] sm:$0xe]  ;;  %945 = vst.msk [vmem:[#allocation3 + $0x10] sm:$0xf] %vm942_vm10, %v2471_v58  ;;  %v2472_v49 = vpack.c.bf16 %v875_v62, %v875_v62  ;;  %v1042_v35 = vshll.u32 %v1018_v51, 16 }
 0x172   :  { %v1020_v16 = vld [vmem:[#allocation3 + $0x8] sm:$0xf]  ;;  %v2384_v32 = vrot.slane %v1216_v9, 9  ;;  %v1260_v22 = vsel %vm3182_vm14, %v2383_v20, %v3626_v19 }
 0x173   :  { %v1390_v25 = vld [vmem:[#allocation3 + $0x8] sm:$0xf]  ;;  %v1041_v48 = vrot.slane %v1039_v0, 4  ;;  %v1053_v18 = vshrl.u32 %v1020_v16, 16  ;;  %v1056_v17 = vshll.u32 %v1020_v16, 16  ;;  %v1044_v42 = vrot.slane %v1042_v35, 5 }
 0x174   :  { %946 = vst.msk [vmem:[#allocation3 + $0x18] sm:$0xf] %vm942_vm10, %v2472_v49  ;;  %v1264_v58 = vsel %vm3182_vm14, %v2384_v32, %v3627_v24  ;;  %v1586_v62 = vld [vmem:[#allocation3 + $0x8] sm:$0xe]  ;;  %v1411_v28 = vshrl.u32 %v1390_v25, 16  ;;  %v1414_v9 = vshll.u32 %v1390_v25, 16 }
 0x175   :  { %v2619_v10 = vld [vmem:[#allocation3] ss:$8 sps:$4 sm:$0xff]   ;;  %v833_v0 = vpop.f32.mrb[8].mxu0  ;;  %v2393_v51 = vcombine.low %v1260_v22, %v1264_v58  ;;  %v1055_v16 = vrot.slane %v1053_v18, 4  ;;  %v1058_v57 = vrot.slane %v1056_v17, 5  ;;  %v1045_v25 = vor.u32 %v1044_v42, %v1041_v48 }
 0x176   :  { %v834_v49 = vadd.f32 %v3097_v2, %v833_v0  ;;  %v2532_v56 = vpop.f32.mrb[9].mxu0  ;;  %v1413_v34 = vrot.slane %v1411_v28, 4  ;;  %1013 = vst.msk [vmem:[#allocation2] sm:$0xff] %vm1012_vm13, %v2619_v10  ;;  %v1416_v20 = vrot.slane %v1414_v9, 5  ;;  %v2408_v35 = vrot.slane %v1586_v62, 9 }
 0x177   :  { %v836_v24 = vpop.f32.mrb[10].mxu0  ;;  %1312 = vrot.lane.b32.xlu0 %v2393_v51, %s2629_s23  ;;  %v1059_v19 = vor.u32 %v1058_v57, %v1055_v16  ;;  %v3628_v22 = vmov 0.0   ;;  %v1046_v0 = vrot.slane %v1045_v25, 4 }
 0x178   :  { %v876_v18 = vmax.f32 %v834_v49, 0.0  ;;  %v837_v17 = vadd.f32 %v3097_v2, %v836_v24  ;;  %v2533_v32 = vpop.f32.mrb[11].mxu0  ;;  %v2609_v10 = vld [vmem:[#allocation3 + $0x8] ss:$8 sps:$4 sm:$0xff]   ;;  %2552 = vmatprep.subr.bf16.mxu1 %v3628_v22  ;;  %v1417_v9 = vor.u32 %v1416_v20, %v1413_v34 }
 0x179   :  { %v1060_v51 = vrot.slane %v1059_v19, 4  ;;  %v1955_v42 = vld [vmem:[#allocation3 + $0x10] sm:$0xe]  ;;  %1369 = vrot.lane.b32.xlu1 %v2609_v10, %s2635_s10  ;;  %v1051_v16 = vsel %vm2696_vm2, %v1046_v0, %v3049_v14  ;;  %2553 = vmatpush3.bf16.msra.mxu1 %v2621_v46  ;;  %v3629_v14 = vrot.slane %v3035_v61, 5  ;;  %v3630_v46 = vshll.u32 %v3178_v13, 16 }
 0x17a   :  { %v2473_v58 = vpack.c.bf16 %v876_v18, %v876_v18  ;;  %v877_v28 = vmax.f32 %v837_v17, 0.0  ;;  %v2433_v56 = vrot.slane %v1955_v42, 9  ;;  %v1588_v60 = vld [vmem:[#allocation3 + $0x10] sm:$0xe]  ;;  %2554 = vmatprep.subr.bf16.mxu1 %v3628_v22  ;;  %v3632_v61 = vrot.slane %v3044_v6, 5 }
 0x17b   :  { %v2610_v57 = vld [vmem:[#allocation3 + $0x10] ss:$8 sps:$4 sm:$0xff]   ;;  %v1065_v49 = vsel %vm2696_vm2, %v1060_v51, %v3051_v15  ;;  %v2409_v34 = vrot.slane %v1588_v60, 9  ;;  %v1629_v15 = vsel %vm3182_vm14, %v2408_v35, %v3629_v14  ;;  %v3227_v10 = vrot.slane %v3630_v46, 5 }
 0x17c   :  { %v1957_v48 = vld [vmem:[#allocation3 + $0x18] sm:$0xe]  ;;  %947 = vst.msk [vmem:[#allocation3 + $0x20] sm:$0xf] %vm942_vm10, %v2473_v58  ;;  %v2474_v62 = vpack.c.bf16 %v877_v28, %v877_v28  ;;  %v1218_v24 = vld [vmem:[#allocation3 + $0x10] sm:$0xe]  ;;  %1738 = vrot.lane.b32.xlu0 %v2610_v57, %s2631_s12  ;;  %v2378_v25 = vcombine.low %v1051_v16, %v1065_v49 }
 0x17d   :  { %v2434_v19 = vrot.slane %v1957_v48, 9  ;;  %v1220_v20 = vld [vmem:[#allocation3 + $0x18] sm:$0xe]  ;;  %v2385_v18 = vrot.slane %v1218_v24, 9  ;;  %v1392_v32 = vld [vmem:[#allocation3 + $0x10] sm:$0xf] }
 0x17e   :  { %948 = vst.msk [vmem:[#allocation3 + $0x28] sm:$0xf] %vm942_vm10, %v2474_v62  ;;  %v2386_v17 = vrot.slane %v1220_v20, 9  ;;  %v841_v58 = vpop.f32.mrb[12].mxu0  ;;  %1193 = vrot.lane.b32.xlu1 %v2378_v25, %s2636_s13  ;;  %v3631_v28 = vrot.slane %v3038_v3, 5  ;;  %v3633_v51 = vrot.slane %v3040_v4, 5 }
 0x17f   :  { %v2002_v35 = vsel %vm3182_vm14, %v2434_v19, %v3632_v61  ;;  %v1425_v42 = vshrl.u32 %v1392_v32, 16  ;;  %v1759_v57 = vld [vmem:[#allocation3 + $0x10] sm:$0xf]  ;;  %v842_v48 = vadd.f32 %v3097_v2, %v841_v58  ;;  %v2536_v62 = vpop.f32.mrb[13].mxu0  ;;  %v3634_v3 = vrot.slane %v3046_v7, 5  ;;  %v2622_v4 = vld [vmem:[%s3591_s3 + $0x10] sm:$0xff]  }
 0x180   :  { %v1998_v0 = vsel %vm3182_vm14, %v2433_v56, %v3631_v28  ;;  %v1633_v13 = vsel %vm3182_vm14, %v2409_v34, %v3633_v51  ;;  %v3247_v6 = vrot.slane %v1417_v9, 4  ;;  %v1761_v56 = vld [vmem:[#allocation3 + $0x18] sm:$0xf]  ;;  %v844_v60 = vpop.f32.mrb[14].mxu0  ;;  %v3635_v25 = vrot.slane %v3042_v5, 5  ;;  %2555 = vmatpush3.bf16.msra.mxu1 %v2622_v4  ;;  %v2623_v51 = vld [vmem:[%s3591_s3 + $0x18] sm:$0xff]  }
 0x181   :  { %v2443_v16 = vcombine.low %v1998_v0, %v2002_v35  ;;  %v1272_v49 = vsel %vm3182_vm14, %v2386_v17, %v3634_v3  ;;  %v2418_v24 = vcombine.low %v1629_v15, %v1633_v13  ;;  %v1427_v34 = vrot.slane %v1425_v42, 4  ;;  %v2537_v9 = vpop.f32.mrb[15].mxu0  ;;  %v1022_v58 = vld [vmem:[#allocation3 + $0x10] sm:$0xf]  ;;  %2556 = vmatprep.subr.bf16.mxu1 %v3628_v22 }
 0x182   :  { %v1268_v19 = vsel %vm3182_vm14, %v2385_v18, %v3635_v25  ;;  %v1428_v20 = vshll.u32 %v1392_v32, 16  ;;  %v878_v7 = vmax.f32 %v842_v48, 0.0  ;;  %v845_v14 = vadd.f32 %v3097_v2, %v844_v60  ;;  %v1024_v18 = vld [vmem:[#allocation3 + $0x18] sm:$0xf] }
 0x183   :  { %2050 = vrot.lane.b32.xlu0 %v2443_v16, %s2637_s16  ;;  %v1780_v17 = vshrl.u32 %v1759_v57, 16  ;;  %v1783_v46 = vshll.u32 %v1759_v57, 16  ;;  %1681 = vrot.lane.b32.xlu1 %v2418_v24, %s2638_s17  ;;  %v2394_v5 = vcombine.low %v1268_v19, %v1272_v49  ;;  %v1794_v28 = vshrl.u32 %v1761_v56, 16  ;;  %v2611_v13 = vld [vmem:[#allocation3 + $0x18] ss:$8 sps:$4 sm:$0xff]  }
 0x184   :  { %v1430_v15 = vrot.slane %v1428_v20, 5  ;;  %v2475_v32 = vpack.c.bf16 %v878_v7, %v878_v7  ;;  %v879_v0 = vmax.f32 %v845_v14, 0.0  ;;  %v1423_v42 = vsel %vm2696_vm2, %v3247_v6, %v3057_v21  ;;  %v1959_v60 = vld [vmem:[#allocation3 + $0x20] sm:$0xe]  ;;  %2557 = vmatpush3.bf16.msra.mxu1 %v2623_v51 }
 0x185   :  { %v1782_v61 = vrot.slane %v1780_v17, 4  ;;  %v1785_v35 = vrot.slane %v1783_v46, 5  ;;  %v1796_v48 = vrot.slane %v1794_v28, 4  ;;  %v1797_v62 = vshll.u32 %v1761_v56, 16  ;;  %2558 = vmatprep.subr.bf16.mxu1 %v3628_v22 }
 0x186   :  { %v1431_v57 = vor.u32 %v1430_v15, %v1427_v34  ;;  %949 = vst.msk [vmem:[#allocation3 + $0x30] sm:$0xf] %vm942_vm10, %v2475_v32  ;;  %v2476_v16 = vpack.c.bf16 %v879_v0, %v879_v0  ;;  %v1067_v49 = vshrl.u32 %v1022_v58, 16  ;;  %v1070_v4 = vshll.u32 %v1022_v58, 16  ;;  %v1590_v15 = vld [vmem:[#allocation3 + $0x18] sm:$0xe] }
 0x187   :  { %1314 = vrot.lane.b32.xlu0 %v2394_v5, %s2629_s23  ;;  %v1786_v3 = vor.u32 %v1785_v35, %v1782_v61  ;;  %1371 = vrot.lane.b32.xlu1 %v2611_v13, %s2635_s10  ;;  %v1799_v25 = vrot.slane %v1797_v62, 5  ;;  %v1081_v19 = vshrl.u32 %v1024_v18, 16  ;;  %v1084_v20 = vshll.u32 %v1024_v18, 16  ;;  %v849_v21 = vpop.f32.mrb[16].mxu0  ;;  %v1961_v5 = vld [vmem:[#allocation3 + $0x28] sm:$0xe] }
 0x188   :  { %v1432_v24 = vrot.slane %v1431_v57, 4  ;;  %950 = vst.msk [vmem:[#allocation3 + $0x38] sm:$0xf] %vm942_vm10, %v2476_v16  ;;  %v1069_v56 = vrot.slane %v1067_v49, 4  ;;  %v1072_v34 = vrot.slane %v1070_v4, 5  ;;  %v2435_v7 = vrot.slane %v1959_v60, 9 }
 0x189   :  { %v1787_v6 = vrot.slane %v1786_v3, 4  ;;  %v850_v14 = vadd.f32 %v3097_v2, %v849_v21  ;;  %v2540_v9 = vpop.f32.mrb[17].mxu0  ;;  %v1800_v46 = vor.u32 %v1799_v25, %v1796_v48  ;;  %v1083_v58 = vrot.slane %v1081_v19, 4  ;;  %v1592_v35 = vld [vmem:[#allocation3 + $0x20] sm:$0xe] }
 0x18a   :  { %v1437_v17 = vsel %vm2696_vm2, %v1432_v24, %v3061_v29  ;;  %v852_v28 = vpop.f32.mrb[18].mxu0  ;;  %v1073_v0 = vor.u32 %v1072_v34, %v1069_v56  ;;  %v1086_v61 = vrot.slane %v1084_v20, 5  ;;  %v3636_v29 = vrot.slane %v3065_v33, 5  ;;  %v2612_v25 = vld [vmem:[#allocation3 + $0x20] ss:$8 sps:$4 sm:$0xff]  }
 0x18b   :  { %v2403_v18 = vcombine.low %v1423_v42, %v1437_v17  ;;  %v1792_v32 = vsel %vm2696_vm2, %v1787_v6, %v3067_v36  ;;  %v880_v51 = vmax.f32 %v850_v14, 0.0  ;;  %v853_v13 = vadd.f32 %v3097_v2, %v852_v28  ;;  %v2541_v57 = vpop.f32.mrb[19].mxu0  ;;  %v1394_v36 = vld [vmem:[#allocation3 + $0x18] sm:$0xf]  ;;  %v1396_v34 = vld [vmem:[#allocation3 + $0x20] sm:$0xf] }
 0x18c   :  { %v1801_v62 = vrot.slane %v1800_v46, 4  ;;  %v2006_v48 = vsel %vm3182_vm14, %v2435_v7, %v3636_v29  ;;  %v1074_v42 = vrot.slane %v1073_v0, 4  ;;  %v1087_v16 = vor.u32 %v1086_v61, %v1083_v58  ;;  %v1763_v7 = vld [vmem:[#allocation3 + $0x20] sm:$0xf] }
 0x18d   :  { %1565 = vrot.lane.b32.xlu0 %v2403_v18, %s2630_s11  ;;  %v2436_v3 = vrot.slane %v1961_v5, 9  ;;  %v2410_v49 = vrot.slane %v1590_v15, 9  ;;  %v2477_v4 = vpack.c.bf16 %v880_v51, %v880_v51  ;;  %v881_v60 = vmax.f32 %v853_v13, 0.0  ;;  %v1222_v28 = vld [vmem:[#allocation3 + $0x20] sm:$0xe] }
 0x18e   :  { %v1806_v24 = vsel %vm2696_vm2, %v1801_v62, %v3073_v40  ;;  %v2411_v19 = vrot.slane %v1592_v35, 9  ;;  %v1079_v33 = vsel %vm2696_vm2, %v1074_v42, %v3075_v41  ;;  %v1088_v21 = vrot.slane %v1087_v16, 4 }
 0x18f   :  { %v2428_v20 = vcombine.low %v1792_v32, %v1806_v24  ;;  %v3637_v6 = vrot.slane %v3069_v37, 5  ;;  %951 = vst.msk [vmem:[#allocation3 + $0x40] sm:$0xf] %vm942_vm10, %v2477_v4  ;;  %v2478_v14 = vpack.c.bf16 %v881_v60, %v881_v60  ;;  %v3638_v40 = vrot.slane %v3063_v31, 5  ;;  %v1765_v37 = vld [vmem:[#allocation3 + $0x28] sm:$0xf] }
 0x190   :  { %v3639_v46 = vrot.slane %v3071_v38, 5  ;;  %v1093_v58 = vsel %vm2696_vm2, %v1088_v21, %v3080_v45  ;;  %v1439_v31 = vshrl.u32 %v1394_v36, 16  ;;  %v1442_v15 = vshll.u32 %v1394_v36, 16  ;;  %v1224_v61 = vld [vmem:[#allocation3 + $0x38] sm:$0xe] }
 0x191   :  { %v2010_v56 = vsel %vm3182_vm14, %v2436_v3, %v3637_v6  ;;  %v1637_v17 = vsel %vm3182_vm14, %v2410_v49, %v3638_v40  ;;  %1934 = vrot.lane.b32.xlu1 %v2428_v20, %s2639_s20  ;;  %1740 = vrot.lane.b32.xlu0 %v2612_v25, %s2631_s12  ;;  %952 = vst.msk [vmem:[#allocation3 + $0x48] sm:$0xf] %vm942_vm10, %v2478_v14  ;;  %v1453_v18 = vshrl.u32 %v1396_v34, 16  ;;  %v1456_v32 = vshll.u32 %v1396_v34, 16  ;;  %v857_v35 = vpop.f32.mrb[20].mxu0 }
 0x192   :  { %v2444_v9 = vcombine.low %v2006_v48, %v2010_v56  ;;  %v1641_v41 = vsel %vm3182_vm14, %v2411_v19, %v3639_v46  ;;  %v2379_v38 = vcombine.low %v1079_v33, %v1093_v58  ;;  %v1808_v0 = vshrl.u32 %v1763_v7, 16  ;;  %v2544_v48 = vpop.f32.mrb[21].mxu0  ;;  %v1026_v24 = vld [vmem:[#allocation3 + $0x20] sm:$0xf]  ;;  %v2624_v6 = vld [vmem:[#allocation3 + $0x10] ss:$8 sps:$4 sm:$0xff]  }
 0x193   :  { %v2419_v5 = vcombine.low %v1637_v17, %v1641_v41  ;;  %v1441_v51 = vrot.slane %v1439_v31, 4  ;;  %v1444_v13 = vrot.slane %v1442_v15, 5  ;;  %v1811_v57 = vshll.u32 %v1763_v7, 16  ;;  %v860_v3 = vpop.f32.mrb[22].mxu0  ;;  %1014 = vst.msk [vmem:[#allocation2 + $0x8] sm:$0xff] %vm1012_vm13, %v2624_v6 }
 0x194   :  { %v1822_v62 = vshrl.u32 %v1765_v37, 16  ;;  %v858_v29 = vadd.f32 %v3097_v2, %v857_v35  ;;  %v1455_v45 = vrot.slane %v1453_v18, 4  ;;  %v1458_v42 = vrot.slane %v1456_v32, 5  ;;  %v2545_v33 = vpop.f32.mrb[23].mxu0  ;;  %v1594_v35 = vld [vmem:[#allocation3 + $0x28] sm:$0xe] }
 0x195   :  { %v1810_v16 = vrot.slane %v1808_v0, 4  ;;  %1195 = vrot.lane.b32.xlu1 %v2379_v38, %s2636_s13  ;;  %2052 = vrot.lane.b32.xlu0 %v2444_v9, %s2637_s16  ;;  %v1445_v49 = vor.u32 %v1444_v13, %v1441_v51  ;;  %v1813_v36 = vrot.slane %v1811_v57, 5  ;;  %v1825_v60 = vshll.u32 %v1765_v37, 16  ;;  %v1963_v37 = vld [vmem:[#allocation3 + $0x30] sm:$0xe] }
 0x196   :  { %v1824_v4 = vrot.slane %v1822_v62, 4  ;;  %v882_v25 = vmax.f32 %v858_v29, 0.0  ;;  %v861_v19 = vadd.f32 %v3097_v2, %v860_v3  ;;  %v1459_v20 = vor.u32 %v1458_v42, %v1455_v45  ;;  %v1596_v57 = vld [vmem:[#allocation3 + $0x40] sm:$0xe] }
 0x197   :  { %v2387_v21 = vrot.slane %v1222_v28, 9  ;;  %v1446_v56 = vrot.slane %v1445_v49, 4  ;;  %v1814_v34 = vor.u32 %v1813_v36, %v1810_v16  ;;  %v1827_v7 = vrot.slane %v1825_v60, 5  ;;  %v1226_v36 = vld [vmem:[#allocation3 + $0x40] sm:$0xe] }
 0x198   :  { %v2388_v14 = vrot.slane %v1224_v61, 9  ;;  %v2479_v40 = vpack.c.bf16 %v882_v25, %v882_v25  ;;  %v883_v17 = vmax.f32 %v861_v19, 0.0  ;;  %v1460_v9 = vrot.slane %v1459_v20, 4  ;;  %v1965_v61 = vld [vmem:[#allocation3 + $0x48] sm:$0xe] }
 0x199   :  { %v3640_v46 = vrot.slane %v3078_v44, 5  ;;  %1683 = vrot.lane.b32.xlu1 %v2419_v5, %s2638_s17  ;;  %v1451_v58 = vsel %vm2696_vm2, %v1446_v56, %v3087_v54  ;;  %v1815_v31 = vrot.slane %v1814_v34, 4  ;;  %v1828_v15 = vor.u32 %v1827_v7, %v1824_v4  ;;  %v1028_v44 = vld [vmem:[#allocation3 + $0x38] sm:$0xf]  ;;  %v865_v62 = vpop.f32.mrb[24].mxu0 }
 0x19a   :  { %v3641_v28 = vrot.slane %v3089_v55, 5  ;;  %953 = vst.msk [vmem:[#allocation3 + $0x50] sm:$0xf] %vm942_vm10, %v2479_v40  ;;  %v2480_v18 = vpack.c.bf16 %v883_v17, %v883_v17  ;;  %v1465_v32 = vsel %vm2696_vm2, %v1460_v9, %v3092_v59  ;;  %v1095_v0 = vshrl.u32 %v1026_v24, 16  ;;  %v2548_v49 = vpop.f32.mrb[25].mxu0 }
 0x19b   :  { %v1276_v41 = vsel %vm3182_vm14, %v2387_v21, %v3640_v46  ;;  %v2404_v54 = vcombine.low %v1451_v58, %v1465_v32  ;;  %v1820_v55 = vsel %vm2696_vm2, %v1815_v31, %v3099_v8  ;;  %v1829_v51 = vrot.slane %v1828_v15, 4  ;;  %v1228_v20 = vld [vmem:[#allocation3 + $0x48] sm:$0xe]  ;;  %v868_v33 = vpop.f32.mrb[26].mxu0  ;;  %v1767_v15 = vld [vmem:[#allocation3 + $0x30] sm:$0xf] }
 0x19c   :  { %v1280_v38 = vsel %vm3182_vm14, %v2388_v14, %v3641_v28  ;;  %v1098_v13 = vshll.u32 %v1026_v24, 16  ;;  %954 = vst.msk [vmem:[#allocation3 + $0x58] sm:$0xf] %vm942_vm10, %v2480_v18  ;;  %v1097_v29 = vrot.slane %v1095_v0, 4  ;;  %v1109_v48 = vshrl.u32 %v1028_v44, 16  ;;  %v2549_v7 = vpop.f32.mrb[27].mxu0 }
 0x19d   :  { %v2395_v5 = vcombine.low %v1276_v41, %v1280_v38  ;;  %v1112_v45 = vshll.u32 %v1028_v44, 16  ;;  %v2437_v42 = vrot.slane %v1963_v37, 9  ;;  %1567 = vrot.lane.b32.xlu0 %v2404_v54, %s2630_s11  ;;  %v866_v59 = vadd.f32 %v3097_v2, %v865_v62  ;;  %v1398_v9 = vld [vmem:[#allocation3 + $0x28] sm:$0xf]  ;;  %v1400_v0 = vld [vmem:[#allocation3 + $0x40] sm:$0xf] }
 0x19e   :  { %v1834_v16 = vsel %vm2696_vm2, %v1829_v51, %v3101_v11  ;;  %v1100_v3 = vrot.slane %v1098_v13, 5  ;;  %v2438_v8 = vrot.slane %v1965_v61, 9  ;;  %v1111_v60 = vrot.slane %v1109_v48, 4  ;;  %v2613_v41 = vld [vmem:[#allocation3 + $0x28] ss:$24 sps:$4 sm:$0xff]  }
 0x19f   :  { %v2429_v4 = vcombine.low %v1820_v55, %v1834_v16  ;;  %v1114_v24 = vrot.slane %v1112_v45, 5  ;;  %v3642_v25 = vrot.slane %v3105_v26, 5  ;;  %v884_v21 = vmax.f32 %v866_v59, 0.0  ;;  %v1030_v48 = vld [vmem:[#allocation3 + $0x40] sm:$0xf] }
 0x1a0   :  { %v1101_v6 = vor.u32 %v1100_v3, %v1097_v29  ;;  %v3643_v56 = vrot.slane %v3107_v27, 5  ;;  %v2412_v34 = vrot.slane %v1594_v35, 9  ;;  %v2413_v17 = vrot.slane %v1596_v57, 9  ;;  %v1769_v57 = vld [vmem:[#allocation3 + $0x48] sm:$0xf] }
 0x1a1   :  { %v2014_v19 = vsel %vm3182_vm14, %v2437_v42, %v3642_v25  ;;  %1936 = vrot.lane.b32.xlu1 %v2429_v4, %s2639_s20  ;;  %v1115_v14 = vor.u32 %v1114_v24, %v1111_v60  ;;  %v2389_v26 = vrot.slane %v1226_v36, 9  ;;  %v2481_v46 = vpack.c.bf16 %v884_v21, %v884_v21  ;;  %1316 = vrot.lane.b32.xlu0 %v2395_v5, %s2629_s23  ;;  %v1032_v3 = vld [vmem:[#allocation3 + $0x48] sm:$0xf] }
 0x1a2   :  { %v2018_v11 = vsel %vm3182_vm14, %v2438_v8, %v3643_v56  ;;  %v1102_v37 = vrot.slane %v1101_v6, 4  ;;  %v3644_v58 = vrot.slane %v3085_v53, 5  ;;  %v2390_v31 = vrot.slane %v1228_v20, 9  ;;  %v2614_v53 = vld [vmem:[#allocation3 + $0x30] ss:$24 sps:$4 sm:$0xff]  }
 0x1a3   :  { %v2445_v40 = vcombine.low %v2014_v19, %v2018_v11  ;;  %v1116_v28 = vrot.slane %v1115_v14, 4  ;;  %v3645_v38 = vrot.slane %v3109_v30, 5  ;;  %v3646_v18 = vrot.slane %v3113_v43, 5  ;;  %955 = vst.msk [vmem:[#allocation3 + $0x60] sm:$0xf] %vm942_vm10, %v2481_v46 }
 0x1a4   :  { %v1645_v27 = vsel %vm3182_vm14, %v2412_v34, %v3644_v58  ;;  %v869_v5 = vadd.f32 %v3097_v2, %v868_v33  ;;  %v1107_v61 = vsel %vm2696_vm2, %v1102_v37, %v3111_v39  ;;  %v3647_v30 = vrot.slane %v3115_v47, 5  ;;  %v1967_v6 = vld [vmem:[#allocation3 + $0x50] sm:$0xe]  ;;  %v1598_v14 = vld [vmem:[#allocation3 + $0x48] sm:$0xe] }
 0x1a5   :  { %v1649_v44 = vsel %vm3182_vm14, %v2413_v17, %v3645_v38  ;;  %v1284_v32 = vsel %vm3182_vm14, %v2389_v26, %v3646_v18  ;;  %v1467_v43 = vshrl.u32 %v1398_v9, 16  ;;  %1373 = vrot.lane.b32.xlu1 %v2613_v41, %s2635_s10  ;;  %v1121_v2 = vsel %vm2696_vm2, %v1116_v28, %v3117_v52  ;;  %1742 = vrot.lane.b32.xlu0 %v2614_v53, %s2631_s12  ;;  %v1969_v41 = vld [vmem:[#allocation3 + $0x58] sm:$0xe]  ;;  %v1230_v18 = vld [vmem:[#allocation3 + $0x50] sm:$0xe]  ;;  %v3649_v53 = vld [vmem:[#allocation6_spill] sm:$0xff] }
 0x1a6   :  { %v2420_v35 = vcombine.low %v1645_v27, %v1649_v44  ;;  %v1288_v54 = vsel %vm3182_vm14, %v2390_v31, %v3647_v30  ;;  %v885_v51 = vmax.f32 %v869_v5, 0.0  ;;  %v1470_v13 = vshll.u32 %v1398_v9, 16  ;;  %v1600_v31 = vld [vmem:[#allocation3 + $0x50] sm:$0xe] }
 0x1a7   :  { %v2396_v55 = vcombine.low %v1284_v32, %v1288_v54  ;;  %v2380_v39 = vcombine.low %v1107_v61, %v1121_v2  ;;  %v1469_v62 = vrot.slane %v1467_v43, 4  ;;  %v1481_v29 = vshrl.u32 %v1400_v0, 16  ;;  %v2615_v32 = vld [vmem:[#allocation3 + $0x48] ss:$8 sps:$4 sm:$0xff]   ;;  %v1232_v54 = vld [vmem:[#allocation3 + $0x58] sm:$0xe] }
 0x1a8   :  { %v1484_v47 = vshll.u32 %v1400_v0, 16  ;;  %v2482_v45 = vpack.c.bf16 %v885_v51, %v885_v51  ;;  %v1472_v42 = vrot.slane %v1470_v13, 5  ;;  %v1836_v59 = vshrl.u32 %v1767_v15, 16  ;;  %v3648_v0 = vld [vmem:[#allocation4_spill] sm:$0xff]  ;;  %v3651_v43 = vld [vmem:[#allocation5_spill] sm:$0xff] }
 0x1a9   :  { %v1839_v16 = vshll.u32 %v1767_v15, 16  ;;  %v1483_v8 = vrot.slane %v1481_v29, 4  ;;  %v1850_v36 = vshrl.u32 %v1769_v57, 16  ;;  %v1853_v52 = vshll.u32 %v1769_v57, 16  ;;  %1197 = vrot.lane.b32.xlu1 %v2380_v39, %s2636_s13  ;;  %2054 = vrot.lane.b32.xlu0 %v2445_v40, %s2637_s16  ;;  %v1402_v13 = vld [vmem:[#allocation3 + $0x48] sm:$0xf] }
 0x1aa   :  { %v1486_v49 = vrot.slane %v1484_v47, 5  ;;  %956 = vst.msk [vmem:[#allocation3 + $0x68] sm:$0xf] %vm942_vm10, %v2482_v45  ;;  %v1473_v4 = vor.u32 %v1472_v42, %v1469_v62  ;;  %v1838_v60 = vrot.slane %v1836_v59, 4  ;;  %v1123_v25 = vshrl.u32 %v1030_v48, 16  ;;  %v3652_v39 = vld [vmem:[#allocation8_spill] sm:$0xff] }
 0x1ab   :  { %v1841_v24 = vrot.slane %v1839_v16, 5  ;;  %v1852_v20 = vrot.slane %v1850_v36, 4  ;;  %v1855_v33 = vrot.slane %v1853_v52, 5  ;;  %v1126_v21 = vshll.u32 %v1030_v48, 16  ;;  %v1404_v45 = vld [vmem:[#allocation3 + $0x50] sm:$0xf] }
 0x1ac   :  { %v1487_v19 = vor.u32 %v1486_v49, %v1483_v8  ;;  %v1474_v56 = vrot.slane %v1473_v4, 4  ;;  %v1125_v34 = vrot.slane %v1123_v25, 4  ;;  %v1137_v7 = vshrl.u32 %v1032_v3, 16  ;;  %v3654_v42 = vld [vmem:[#allocation7_spill] sm:$0xff]  ;;  %v3655_v8 = vld [vmem:[#allocation9_spill] sm:$0xff]  ;;  %v3657_v4 = vld [vmem:[#allocation10_spill] sm:$0xff] }
 0x1ad   :  { %v1842_v11 = vor.u32 %v1841_v24, %v1838_v60  ;;  %v1856_v26 = vor.u32 %v1855_v33, %v1852_v20  ;;  %v1128_v9 = vrot.slane %v1126_v21, 5  ;;  %v1140_v46 = vshll.u32 %v1032_v3, 16  ;;  %1685 = vrot.lane.b32.xlu1 %v2420_v35, %s2638_s17  ;;  %1318 = vrot.lane.b32.xlu0 %v2396_v55, %s2629_s23  ;;  %v2616_v52 = vld [vmem:[#allocation3 + $0x50] ss:$8 sps:$4 sm:$0xff]   ;;  %v3659_v25 = vld [vmem:[#allocation11_spill] sm:$0xff] }
 0x1ae   :  { %v1488_v17 = vrot.slane %v1487_v19, 4  ;;  %v1479_v40 = vsel %vm2696_vm2, %v1474_v56, %v3123_v63  ;;  %v1139_v58 = vrot.slane %v1137_v7, 4  ;;  %v2439_v27 = vrot.slane %v1967_v6, 9  ;;  %v1771_v6 = vld [vmem:[#allocation3 + $0x50] sm:$0xf]  ;;  %v3661_v56 = vld [vmem:[#allocation13_spill] sm:$0xff] }
 0x1af   :  { %v1843_v37 = vrot.slane %v1842_v11, 4  ;;  %v1857_v28 = vrot.slane %v1856_v26, 4  ;;  %v1129_v38 = vor.u32 %v1128_v9, %v1125_v34  ;;  %v1142_v44 = vrot.slane %v1140_v46, 5  ;;  %v1034_v26 = vld [vmem:[#allocation3 + $0x50] sm:$0xf] }
 0x1b0   :  { %v1493_v15 = vsel %vm2696_vm2, %v1488_v17, %v3127_v12  ;;  %v3650_v61 = vrot.slane %v3649_v53, 5  ;;  %v2440_v30 = vrot.slane %v1969_v41, 9  ;;  %v2414_v51 = vrot.slane %v1598_v14, 9  ;;  %v1773_v17 = vld [vmem:[#allocation3 + $0x58] sm:$0xf]  ;;  %v3662_v46 = vld [vmem:[#allocation12_spill] sm:$0xff] }
 0x1b1   :  { %v2405_v5 = vcombine.low %v1479_v40, %v1493_v15  ;;  %v1848_v63 = vsel %vm2696_vm2, %v1843_v37, %v3648_v0  ;;  %v1862_v12 = vsel %vm2696_vm2, %v1857_v28, %v3651_v43  ;;  %v1130_v2 = vrot.slane %v1129_v38, 4  ;;  %1375 = vrot.lane.b32.xlu1 %v2615_v32, %s2635_s10  ;;  %v1406_v0 = vld [vmem:[#allocation3 + $0x58] sm:$0xf] }
 0x1b2   :  { %v2022_v35 = vsel %vm3182_vm14, %v2439_v27, %v3650_v61  ;;  %v1143_v55 = vor.u32 %v1142_v44, %v1139_v58  ;;  %v2430_v57 = vcombine.low %v1848_v63, %v1862_v12  ;;  %v3653_v62 = vrot.slane %v3652_v39, 5  ;;  %v1036_v27 = vld [vmem:[#allocation3 + $0x58] sm:$0xf]  ;;  %v1408_v39 = vld [vmem:[#allocation3 + $0x60] sm:$0xf] }
 0x1b3   :  { %v2415_v47 = vrot.slane %v1600_v31, 9  ;;  %v2391_v48 = vrot.slane %v1230_v18, 9  ;;  %1569 = vrot.lane.b32.xlu0 %v2405_v5, %s2630_s11  ;;  %v1135_v59 = vsel %vm2696_vm2, %v1130_v2, %v3654_v42  ;;  %v3656_v49 = vrot.slane %v3655_v8, 5  ;;  %v3664_v42 = vld [vmem:[#allocation16_spill] sm:$0xff] }
 0x1b4   :  { %v2026_v29 = vsel %vm3182_vm14, %v2440_v30, %v3653_v62  ;;  %v1144_v16 = vrot.slane %v1143_v55, 4  ;;  %v3658_v60 = vrot.slane %v3657_v4, 5  ;;  %v3660_v19 = vrot.slane %v3659_v25, 5  ;;  %v2626_v30 = vld [vmem:[#allocation3 + $0x20] ss:$24 sps:$4 sm:$0xff]  }
 0x1b5   :  { %v2446_v3 = vcombine.low %v2022_v35, %v2026_v29  ;;  %v1653_v36 = vsel %vm3182_vm14, %v2414_v51, %v3656_v49  ;;  %v2392_v33 = vrot.slane %v1232_v54, 9  ;;  %v1495_v21 = vshrl.u32 %v1402_v13, 16  ;;  %1938 = vrot.lane.b32.xlu1 %v2430_v57, %s2639_s20  ;;  %1015 = vst.msk [vmem:[#allocation2 + $0x10] sm:$0xff] %vm1012_vm13, %v2626_v30  ;;  %v1777_v30 = vld [vmem:[#allocation3 + $0x68] sm:$0xf] }
 0x1b6   :  { %v1657_v24 = vsel %vm3182_vm14, %v2415_v47, %v3658_v60  ;;  %v1292_v20 = vsel %vm3182_vm14, %v2391_v48, %v3660_v19  ;;  %v1149_v11 = vsel %vm2696_vm2, %v1144_v16, %v3661_v56  ;;  %v1498_v7 = vshll.u32 %v1402_v13, 16 }
 0x1b7   :  { %v2421_v34 = vcombine.low %v1653_v36, %v1657_v24  ;;  %v1509_v14 = vshrl.u32 %v1404_v45, 16  ;;  %v2381_v9 = vcombine.low %v1135_v59, %v1149_v11  ;;  %v3663_v41 = vrot.slane %v3662_v46, 5  ;;  %1744 = vrot.lane.b32.xlu0 %v2616_v52, %s2631_s12  ;;  %v3665_v36 = vld [vmem:[#allocation17_spill] sm:$0xff] }
 0x1b8   :  { %v1497_v37 = vrot.slane %v1495_v21, 4  ;;  %v1512_v58 = vshll.u32 %v1404_v45, 16  ;;  %v1500_v15 = vrot.slane %v1498_v7, 5  ;;  %v1864_v38 = vshrl.u32 %v1771_v6, 16  ;;  %v2627_v45 = vld [vmem:[#allocation3 + $0x40] ss:$8 sps:$4 sm:$0xff]  }
 0x1b9   :  { %v1296_v40 = vsel %vm3182_vm14, %v2392_v33, %v3663_v41  ;;  %v1511_v28 = vrot.slane %v1509_v14, 4  ;;  %v1867_v18 = vshll.u32 %v1771_v6, 16  ;;  %v1878_v32 = vshrl.u32 %v1773_v17, 16  ;;  %1199 = vrot.lane.b32.xlu1 %v2381_v9, %s2636_s13  ;;  %1016 = vst.msk [vmem:[#allocation2 + $0x18] sm:$0xff] %vm1012_vm13, %v2627_v45  ;;  %v3441_v33 = vld [vmem:[#allocation3 + $0x6c] sm:$0x1] }
 0x1ba   :  { %v2397_v31 = vcombine.low %v1292_v20, %v1296_v40  ;;  %v1514_v44 = vrot.slane %v1512_v58, 5  ;;  %v1881_v5 = vshll.u32 %v1773_v17, 16  ;;  %v1501_v63 = vor.u32 %v1500_v15, %v1497_v37  ;;  %v3439_v20 = vld [vmem:[#allocation3 + $0x64] sm:$0x1]  ;;  %v2617_v21 = vld [vmem:[#allocation3 + $0x58] ss:$8 sps:$4 sm:$0xff]  }
 0x1bb   :  { %v1866_v53 = vrot.slane %v1864_v38, 4  ;;  %v1151_v61 = vshrl.u32 %v1034_v26, 16  ;;  %v1154_v35 = vshll.u32 %v1034_v26, 16  ;;  %v1869_v43 = vrot.slane %v1867_v18, 5  ;;  %2056 = vrot.lane.b32.xlu0 %v2446_v3, %s2637_s16  ;;  %v2628_v3 = vld [vmem:[#allocation3 + $0x50] ss:$8 sps:$4 sm:$0xff]  }
 0x1bc   :  { %v1515_v54 = vor.u32 %v1514_v44, %v1511_v28  ;;  %v1880_v12 = vrot.slane %v1878_v32, 4  ;;  %v1883_v2 = vrot.slane %v1881_v5, 5  ;;  %v1502_v55 = vrot.slane %v1501_v63, 4  ;;  %1017 = vst.msk [vmem:[#allocation2 + $0x20] sm:$0xff] %vm1012_vm13, %v2628_v3  ;;  %v1776_v7 = vld [vmem:[#allocation3 + $0x64] sm:$0x1] }
 0x1bd   :  { %v1153_v51 = vrot.slane %v1151_v61, 4  ;;  %v1156_v13 = vrot.slane %v1154_v35, 5  ;;  %v1165_v57 = vshrl.u32 %v1036_v27, 16  ;;  %v1870_v29 = vor.u32 %v1869_v43, %v1866_v53  ;;  %1687 = vrot.lane.b32.xlu1 %v2421_v34, %s2638_s17  ;;  %v3666_v14 = vld [vmem:[#allocation18_spill] sm:$0xff]  ;;  %v3667_v26 = vld [vmem:[#allocation19_spill] sm:$0xff]  ;;  %v3668_v63 = vld [vmem:[#allocation20_spill] sm:$0xff] }
 0x1be   :  { %v1516_v62 = vrot.slane %v1515_v54, 4  ;;  %v1884_v47 = vor.u32 %v1883_v2, %v1880_v12  ;;  %v1168_v48 = vshll.u32 %v1036_v27, 16  ;;  %v1507_v59 = vsel %vm2696_vm2, %v1502_v55, %v3664_v42  ;;  %v1602_v40 = vld [vmem:[#allocation3 + $0x58] sm:$0xe]  ;;  %v1775_v37 = vld [vmem:[#allocation3 + $0x60] sm:$0xf] }
 0x1bf   :  { %v1157_v16 = vor.u32 %v1156_v13, %v1153_v51  ;;  %v1167_v8 = vrot.slane %v1165_v57, 4  ;;  %v1523_v49 = vshrl.u32 %v1406_v0, 16  ;;  %v1871_v4 = vrot.slane %v1870_v29, 4  ;;  %1320 = vrot.lane.b32.xlu0 %v2397_v31, %s2629_s23  ;;  %v1604_v31 = vld [vmem:[#allocation3 + $0x60] sm:$0xe]  ;;  %v3669_v12 = vld [vmem:[#allocation21_spill] sm:$0xff] }
 0x1c0   :  { %v1521_v52 = vsel %vm2696_vm2, %v1516_v62, %v3665_v36  ;;  %v1885_v60 = vrot.slane %v1884_v47, 4  ;;  %v1170_v24 = vrot.slane %v1168_v48, 5  ;;  %v1526_v19 = vshll.u32 %v1406_v0, 16  ;;  %v1971_v18 = vld [vmem:[#allocation3 + $0x60] sm:$0xe] }
 0x1c1   :  { %v1525_v25 = vrot.slane %v1523_v49, 4  ;;  %v2406_v6 = vcombine.low %v1507_v59, %v1521_v52  ;;  %v1158_v56 = vrot.slane %v1157_v16, 4  ;;  %v1537_v34 = vshrl.u32 %v1408_v39, 16  ;;  %1377 = vrot.lane.b32.xlu1 %v2617_v21, %s2635_s10  ;;  %v1778_v32 = vld [vmem:[#allocation3 + $0x6c] sm:$0x1]  ;;  %v3670_v36 = vld [vmem:[#allocation14_spill] sm:$0xff] }
 0x1c2   :  { %v1171_v11 = vor.u32 %v1170_v24, %v1167_v8  ;;  %v1876_v17 = vsel %vm2696_vm2, %v1871_v4, %v3666_v14  ;;  %v1890_v9 = vsel %vm2696_vm2, %v1885_v60, %v3667_v26  ;;  %v1528_v46 = vrot.slane %v1526_v19, 5  ;;  %v1973_v35 = vld [vmem:[#allocation3 + $0x68] sm:$0xe]  ;;  %v2625_v49 = vld [vmem:[%s3591_s3 + $0x20] ss:$0 sps:$4 sm:$0xff]  }
 0x1c3   :  { %v1540_v41 = vshll.u32 %v1408_v39, 16  ;;  %v1539_v27 = vrot.slane %v1537_v34, 4  ;;  %v2029_v15 = vrot.slane %v3439_v20, 5  ;;  %v2033_v28 = vrot.slane %v3441_v33, 5  ;;  %1571 = vrot.lane.b32.xlu0 %v2406_v6, %s2630_s11  ;;  %v2618_v43 = vld [vmem:[#allocation3 + $0x60] ss:$8 sps:$4 sm:$0xff]  }
 0x1c4   :  { %v1172_v58 = vrot.slane %v1171_v11, 4  ;;  %v1529_v38 = vor.u32 %v1528_v46, %v1525_v25  ;;  %v1901_v5 = vshll.u32 %v1776_v7, 16  ;;  %v2431_v0 = vcombine.low %v1876_v17, %v1890_v9 }
 0x1c5   :  { %v1542_v44 = vrot.slane %v1540_v41, 5  ;;  %v1163_v53 = vsel %vm2696_vm2, %v1158_v56, %v3668_v63  ;;  %v2416_v61 = vrot.slane %v1602_v40, 9  ;;  %v1892_v54 = vshrl.u32 %v1775_v37, 16 }
 0x1c6   :  { %v1177_v2 = vsel %vm2696_vm2, %v1172_v58, %v3669_v12  ;;  %v1530_v55 = vrot.slane %v1529_v38, 4  ;;  %v2417_v13 = vrot.slane %v1604_v31, 9  ;;  %1940 = vrot.lane.b32.xlu1 %v2431_v0, %s2639_s20  ;;  %v2441_v57 = vrot.slane %v1971_v18, 9 }
 0x1c7   :  { %v1543_v51 = vor.u32 %v1542_v44, %v1539_v27  ;;  %v1894_v39 = vrot.slane %v1892_v54, 4  ;;  %v1895_v62 = vshll.u32 %v1775_v37, 16  ;;  %v1915_v29 = vshll.u32 %v1778_v32, 16  ;;  %1746 = vrot.lane.b32.xlu0 %v2618_v43, %s2631_s12 }
 0x1c8   :  { %v1535_v47 = vsel %vm2696_vm2, %v1530_v55, %v3198_v1  ;;  %v2442_v45 = vrot.slane %v1973_v35, 9  ;;  %v1906_v42 = vshrl.u32 %v1777_v30, 16  ;;  %v2382_v59 = vcombine.low %v1163_v53, %v1177_v2  ;;  %v3672_v1 = vld [vmem:[#allocation15_spill] sm:$0xff] }
 0x1c9   :  { %v1544_v48 = vrot.slane %v1543_v51, 4  ;;  %v1897_v16 = vrot.slane %v1895_v62, 5  ;;  %v1909_v8 = vshll.u32 %v1777_v30, 16  ;;  %v3671_v52 = vrot.slane %v3670_v36, 5 }
 0x1ca   :  { %v3673_v60 = vrot.slane %v3672_v1, 5  ;;  %v1908_v25 = vrot.slane %v1906_v42, 4  ;;  %1201 = vrot.lane.b32.xlu1 %v2382_v59, %s2636_s13  ;;  %v1903_v33 = vrot.slane %v1901_v5, 5  ;;  %v2034_v6 = vsel %vm3182_vm14, %v2442_v45, %v2033_v28 }
 0x1cb   :  { %v1549_v3 = vsel %vm2696_vm2, %v1544_v48, %v3227_v10  ;;  %v1661_v4 = vsel %vm3182_vm14, %v2416_v61, %v3671_v52  ;;  %v1898_v20 = vor.u32 %v1897_v16, %v1894_v39  ;;  %v1911_v21 = vrot.slane %v1909_v8, 5 }
 0x1cc   :  { %v1665_v24 = vsel %vm3182_vm14, %v2417_v13, %v3673_v60  ;;  %v2407_v19 = vcombine.low %v1535_v47, %v1549_v3  ;;  %v2030_v10 = vsel %vm3182_vm14, %v2441_v57, %v2029_v15  ;;  %v1917_v56 = vrot.slane %v1915_v29, 5 }
 0x1cd   :  { %v2422_v11 = vcombine.low %v1661_v4, %v1665_v24  ;;  %v1899_v34 = vrot.slane %v1898_v20, 4  ;;  %v1912_v7 = vor.u32 %v1911_v21, %v1908_v25  ;;  %v2137_v14 = vsel %vm2135_vm15, %v2625_v49, 0  ;;  %v2448_v24 = vld [vmem:[%s3592_s4] ss:$0 sm:$0xff] }
 0x1ce   :  { %1573 = vrot.lane.b32.xlu0 %v2407_v19, %s2630_s11  ;;  %2559 = vmatpush3.bf16.msra.mxu1 %v2137_v14  ;;  %v2447_v17 = vcombine.low %v2030_v10, %v2034_v6 }
 0x1cf   :  { %1689 = vrot.lane.b32.xlu1 %v2422_v11, %s2638_s17  ;;  %v1904_v26 = vsel %vm2696_vm2, %v1899_v34, %v1903_v33  ;;  %v1913_v9 = vrot.slane %v1912_v7, 4 }
 0x1d1   :  { %v1918_v50 = vsel %vm2696_vm2, %v1913_v9, %v1917_v56  ;;  %vm1580_vm2 = vcmask 326912  }
 0x1d2   :  { %2058 = vrot.lane.b32.xlu0 %v2447_v17, %s2637_s16  ;;  %v2432_v46 = vcombine.low %v1904_v26, %v1918_v50 }
 0x1d4   :  { %1942 = vrot.lane.b32.xlu1 %v2432_v46, %s2639_s20 }
 0x1e9   :  { %v1313_v41 = vpop.permute.xlu0 %1312 }
 0x1eb   :  { %v1370_v40 = vpop.permute.xlu1 %1369 }
 0x1ee   :  { %v1739_v37 = vpop.permute.xlu0 %1738 }
 0x1f0   :  { %v1194_v58 = vpop.permute.xlu1 %1193 }
 0x1f1   :  { %1209 = vst.msk [vmem:[#allocation2] sm:$0xff] %vm1208_vm0, %v1194_v58 }
 0x1f2   :  { %1328 = vst.msk [vmem:[#allocation2] sm:$0xff] %vm1327_vm1, %v1313_v41 }
 0x1f3   :  { %1385 = vst.msk [vmem:[#allocation2] sm:$0xff] %vm1384_vm3, %v1370_v40 }
 0x1f5   :  { %v2051_v27 = vpop.permute.xlu0 %2050  ;;  %v1682_v31 = vpop.permute.xlu1 %1681 }
 0x1f9   :  { %v1315_v23 = vpop.permute.xlu0 %1314  ;;  %v1372_v15 = vpop.permute.xlu1 %1371 }
 0x1ff   :  { %v1566_v28 = vpop.permute.xlu0 %1565 }
 0x200   :  { %1581 = vst.msk [vmem:[#allocation2] sm:$0xff] %vm1580_vm2, %v1566_v28 }
 0x201   :  { %1697 = vst.msk [vmem:[#allocation2] sm:$0xff] %vm1696_vm5, %v1682_v31 }
 0x202   :  { %1754 = vst.msk [vmem:[#allocation2] sm:$0xff] %vm1753_vm6, %v1739_v37 }
 0x203   :  { %v1935_v38 = vpop.permute.xlu1 %1934  ;;  %v1741_v44 = vpop.permute.xlu0 %1740 }
 0x204   :  { %1950 = vst.msk [vmem:[#allocation2] sm:$0xff] %vm1949_vm7, %v1935_v38 }
 0x205   :  { %2066 = vst.msk [vmem:[#allocation2] sm:$0xff] %vm2065_vm8, %v2051_v27 }
 0x207   :  { %v1196_v18 = vpop.permute.xlu1 %1195  ;;  %v2053_v32 = vpop.permute.xlu0 %2052 }
 0x208   :  { %1210 = vst.msk [vmem:[#allocation2 + $0x8] sm:$0xff] %vm1208_vm0, %v1196_v18 }
 0x209   :  { %1329 = vst.msk [vmem:[#allocation2 + $0x8] sm:$0xff] %vm1327_vm1, %v1315_v23 }
 0x20a   :  { %1386 = vst.msk [vmem:[#allocation2 + $0x8] sm:$0xff] %vm1384_vm3, %v1372_v15 }
 0x20b   :  { %v1684_v5 = vpop.permute.xlu1 %1683 }
 0x20c   :  { %v2071_v0 = vld [vmem:[#allocation2] sm:$0xff] }
 0x20d   :  { %2561 = vmatmul.mubr.msk.bf16.vlgmr.msra.gmra.mrb[0].mxu1 %vm2119_vm9, %v2071_v0 }
 0x20e   :  { %2564 = vmatprep.mubr.msk.bf16.mxu1 %vm2633_vm4, %v3628_v22 }
 0x20f   :  { %v1568_v63 = vpop.permute.xlu0 %1567 }
 0x210   :  { %1582 = vst.msk [vmem:[#allocation2 + $0x8] sm:$0xff] %vm1580_vm2, %v1568_v63 }
 0x211   :  { %1698 = vst.msk [vmem:[#allocation2 + $0x8] sm:$0xff] %vm1696_vm5, %v1684_v5 }
 0x212   :  { %1755 = vst.msk [vmem:[#allocation2 + $0x8] sm:$0xff] %vm1753_vm6, %v1741_v44 }
 0x213   :  { %v1937_v53 = vpop.permute.xlu1 %1936  ;;  %v1317_v61 = vpop.permute.xlu0 %1316 }
 0x214   :  { %1951 = vst.msk [vmem:[#allocation2 + $0x8] sm:$0xff] %vm1949_vm7, %v1937_v53 }
 0x215   :  { %2067 = vst.msk [vmem:[#allocation2 + $0x8] sm:$0xff] %vm2065_vm8, %v2053_v32 }
 0x217   :  { %v1374_v35 = vpop.permute.xlu1 %1373  ;;  %v1743_v30 = vpop.permute.xlu0 %1742 }
 0x21b   :  { %v1198_v54 = vpop.permute.xlu1 %1197  ;;  %v2055_v43 = vpop.permute.xlu0 %2054 }
 0x21c   :  { %1211 = vst.msk [vmem:[#allocation2 + $0x10] sm:$0xff] %vm1208_vm0, %v1198_v54  ;;  %v2072_v12 = vld [vmem:[#allocation2 + $0x8] sm:$0xff] }
 0x21d   :  { %1330 = vst.msk [vmem:[#allocation2 + $0x10] sm:$0xff] %vm1327_vm1, %v1317_v61  ;;  %2565 = vmatmul.mubr.msk.bf16.gmra.mrb[4].mxu1 %vm2119_vm9, %v2072_v12 }
 0x21e   :  { %1387 = vst.msk [vmem:[#allocation2 + $0x10] sm:$0xff] %vm1384_vm3, %v1374_v35  ;;  %2568 = vmatprep.mubr.msk.bf16.mxu1 %vm2633_vm4, %v3628_v22 }
 0x21f   :  { %v1686_v2 = vpop.permute.xlu1 %1685  ;;  %v1319_v55 = vpop.permute.xlu0 %1318 }
 0x223   :  { %v1376_v51 = vpop.permute.xlu1 %1375 }
 0x225   :  { %v1570_v13 = vpop.permute.xlu0 %1569 }
 0x226   :  { %1583 = vst.msk [vmem:[#allocation2 + $0x10] sm:$0xff] %vm1580_vm2, %v1570_v13 }
 0x227   :  { %1699 = vst.msk [vmem:[#allocation2 + $0x10] sm:$0xff] %vm1696_vm5, %v1686_v2  ;;  %v1939_v57 = vpop.permute.xlu1 %1938 }
 0x228   :  { %1756 = vst.msk [vmem:[#allocation2 + $0x10] sm:$0xff] %vm1753_vm6, %v1743_v30 }
 0x229   :  { %1952 = vst.msk [vmem:[#allocation2 + $0x10] sm:$0xff] %vm1949_vm7, %v1939_v57  ;;  %v1745_v39 = vpop.permute.xlu0 %1744 }
 0x22a   :  { %2068 = vst.msk [vmem:[#allocation2 + $0x10] sm:$0xff] %vm2065_vm8, %v2055_v43 }
 0x22b   :  { %v1200_v62 = vpop.permute.xlu1 %1199 }
 0x22c   :  { %1212 = vst.msk [vmem:[#allocation2 + $0x18] sm:$0xff] %vm1208_vm0, %v1200_v62 }
 0x22d   :  { %v2057_v29 = vpop.permute.xlu0 %2056  ;;  %1331 = vst.msk [vmem:[#allocation2 + $0x18] sm:$0xff] %vm1327_vm1, %v1319_v55 }
 0x22e   :  { %1388 = vst.msk [vmem:[#allocation2 + $0x18] sm:$0xff] %vm1384_vm3, %v1376_v51 }
 0x22f   :  { %v1688_v47 = vpop.permute.xlu1 %1687 }
 0x231   :  { %v1321_v48 = vpop.permute.xlu0 %1320  ;;  %v2073_v45 = vld [vmem:[#allocation2 + $0x10] sm:$0xff] }
 0x232   :  { %2569 = vmatmul.mubr.msk.bf16.gmra.mrb[8].mxu1 %vm2119_vm9, %v2073_v45 }
 0x233   :  { %2572 = vmatprep.mubr.msk.bf16.mxu1 %vm2633_vm4, %v3628_v22  ;;  %v1378_v42 = vpop.permute.xlu1 %1377 }
 0x235   :  { %v1572_v59 = vpop.permute.xlu0 %1571 }
 0x236   :  { %1584 = vst.msk [vmem:[#allocation2 + $0x18] sm:$0xff] %vm1580_vm2, %v1572_v59 }
 0x237   :  { %1700 = vst.msk [vmem:[#allocation2 + $0x18] sm:$0xff] %vm1696_vm5, %v1688_v47 }
 0x238   :  { %1757 = vst.msk [vmem:[#allocation2 + $0x18] sm:$0xff] %vm1753_vm6, %v1745_v39  ;;  %v1941_v16 = vpop.permute.xlu1 %1940 }
 0x239   :  { %1953 = vst.msk [vmem:[#allocation2 + $0x18] sm:$0xff] %vm1949_vm7, %v1941_v16  ;;  %v1747_v8 = vpop.permute.xlu0 %1746 }
 0x23a   :  { %2069 = vst.msk [vmem:[#allocation2 + $0x18] sm:$0xff] %vm2065_vm8, %v2057_v29 }
 0x23c   :  { %v1202_v49 = vpop.permute.xlu1 %1201 }
 0x23d   :  { %1213 = vst.msk [vmem:[#allocation2 + $0x20] sm:$0xff] %vm1208_vm0, %v1202_v49 }
 0x23e   :  { %1332 = vst.msk [vmem:[#allocation2 + $0x20] sm:$0xff] %vm1327_vm1, %v1321_v48 }
 0x23f   :  { %1389 = vst.msk [vmem:[#allocation2 + $0x20] sm:$0xff] %vm1384_vm3, %v1378_v42 }
 0x240   :  { %v1574_v3 = vpop.permute.xlu0 %1573 }
 0x241   :  { %1585 = vst.msk [vmem:[#allocation2 + $0x20] sm:$0xff] %vm1580_vm2, %v1574_v3  ;;  %v1690_v36 = vpop.permute.xlu1 %1689  ;;  %v2074_v52 = vld [vmem:[#allocation2 + $0x18] sm:$0xff] }
 0x242   :  { %1701 = vst.msk [vmem:[#allocation2 + $0x20] sm:$0xff] %vm1696_vm5, %v1690_v36  ;;  %2573 = vmatmul.mubr.msk.bf16.gmra.mrb[12].mxu1 %vm2119_vm9, %v2074_v52 }
 0x243   :  { %1758 = vst.msk [vmem:[#allocation2 + $0x20] sm:$0xff] %vm1753_vm6, %v1747_v8  ;;  %2576 = vmatprep.mubr.msk.bf16.mxu1 %vm2633_vm4, %v3628_v22  ;;  %vm2262_vm4 = vcmask 125952  }
 0x244   :  { %v2059_v1 = vpop.permute.xlu0 %2058 }
 0x246   :  { %v1943_v4 = vpop.permute.xlu1 %1942 }
 0x247   :  { %1954 = vst.msk [vmem:[#allocation2 + $0x20] sm:$0xff] %vm1949_vm7, %v1943_v4 }
 0x248   :  { %2070 = vst.msk [vmem:[#allocation2 + $0x20] sm:$0xff] %vm2065_vm8, %v2059_v1 }
 0x24f   :  { %v2075_v60 = vld [vmem:[#allocation2 + $0x20] sm:$0xff] }
 0x250   :  { %2577 = vmatmul.mubr.msk.bf16.gmra.mrb[16].mxu1 %vm2119_vm9, %v2075_v60 }
 0x2e0   :  { %v2173_v25 = vpop.f32.mrb[0].mxu1 }
 0x2e1   :  { %v2174_v19 = vadd.f32 %v2448_v24, %v2173_v25  ;;  %v2562_v20 = vpop.f32.mrb[1].mxu1 }
 0x2e2   :  { %v2176_v33 = vpop.f32.mrb[2].mxu1 }
 0x2e3   :  { %v2212_v21 = vmax.f32 %v2174_v19, 0.0  ;;  %v2177_v10 = vadd.f32 %v2448_v24, %v2176_v33  ;;  %v2563_v22 = vpop.f32.mrb[3].mxu1 }
 0x2e5   :  { %v2483_v6 = vpack.c.bf16 %v2212_v21, %v2212_v21  ;;  %v2213_v56 = vmax.f32 %v2177_v10, 0.0 }
 0x2e7   :  { %2263 = vst.msk [vmem:[%s3593_s5] sm:$0xf] %vm2262_vm4, %v2483_v6  ;;  %v2484_v11 = vpack.c.bf16 %v2213_v56, %v2213_v56 }
 0x2e9   :  { %2264 = vst.msk [vmem:[%s3593_s5 + $0x4] sm:$0xf] %vm2262_vm4, %v2484_v11 }
 0x2f0   :  { %v2181_v34 = vpop.f32.mrb[4].mxu1 }
 0x2f1   :  { %v2182_v7 = vadd.f32 %v2448_v24, %v2181_v34  ;;  %v2566_v14 = vpop.f32.mrb[5].mxu1 }
 0x2f2   :  { %v2184_v17 = vpop.f32.mrb[6].mxu1 }
 0x2f3   :  { %v2214_v26 = vmax.f32 %v2182_v7, 0.0  ;;  %v2185_v9 = vadd.f32 %v2448_v24, %v2184_v17  ;;  %v2567_v50 = vpop.f32.mrb[7].mxu1 }
 0x2f5   :  { %v2485_v46 = vpack.c.bf16 %v2214_v26, %v2214_v26  ;;  %v2215_v41 = vmax.f32 %v2185_v9, 0.0 }
 0x2f7   :  { %2265 = vst.msk [vmem:[%s3593_s5 + $0x8] sm:$0xf] %vm2262_vm4, %v2485_v46  ;;  %v2486_v40 = vpack.c.bf16 %v2215_v41, %v2215_v41 }
 0x2f9   :  { %2266 = vst.msk [vmem:[%s3593_s5 + $0xc] sm:$0xf] %vm2262_vm4, %v2486_v40 }
 0x305   :  { %v2189_v37 = vpop.f32.mrb[8].mxu1 }
 0x306   :  { %v2190_v58 = vadd.f32 %v2448_v24, %v2189_v37  ;;  %v2570_v27 = vpop.f32.mrb[9].mxu1 }
 0x307   :  { %v2192_v31 = vpop.f32.mrb[10].mxu1 }
 0x308   :  { %v2216_v23 = vmax.f32 %v2190_v58, 0.0  ;;  %v2193_v15 = vadd.f32 %v2448_v24, %v2192_v31  ;;  %v2571_v28 = vpop.f32.mrb[11].mxu1 }
 0x30a   :  { %v2487_v38 = vpack.c.bf16 %v2216_v23, %v2216_v23  ;;  %v2217_v44 = vmax.f32 %v2193_v15, 0.0 }
 0x30c   :  { %2267 = vst.msk [vmem:[%s3593_s5 + $0x10] sm:$0xf] %vm2262_vm4, %v2487_v38  ;;  %v2488_v18 = vpack.c.bf16 %v2217_v44, %v2217_v44 }
 0x30e   :  { %2268 = vst.msk [vmem:[%s3593_s5 + $0x14] sm:$0xf] %vm2262_vm4, %v2488_v18 }
 0x315   :  { %v2197_v32 = vpop.f32.mrb[12].mxu1 }
 0x316   :  { %v2198_v5 = vadd.f32 %v2448_v24, %v2197_v32  ;;  %v2574_v0 = vpop.f32.mrb[13].mxu1 }
 0x317   :  { %v2200_v63 = vpop.f32.mrb[14].mxu1 }
 0x318   :  { %v2218_v53 = vmax.f32 %v2198_v5, 0.0  ;;  %v2201_v61 = vadd.f32 %v2448_v24, %v2200_v63  ;;  %v2575_v35 = vpop.f32.mrb[15].mxu1 }
 0x31a   :  { %v2489_v30 = vpack.c.bf16 %v2218_v53, %v2218_v53  ;;  %v2219_v54 = vmax.f32 %v2201_v61, 0.0 }
 0x31c   :  { %2269 = vst.msk [vmem:[%s3593_s5 + $0x18] sm:$0xf] %vm2262_vm4, %v2489_v30  ;;  %v2490_v43 = vpack.c.bf16 %v2219_v54, %v2219_v54 }
 0x31e   :  { %2270 = vst.msk [vmem:[%s3593_s5 + $0x1c] sm:$0xf] %vm2262_vm4, %v2490_v43 }
 0x323   :  { %v2205_v12 = vpop.f32.mrb[16].mxu1 }
 0x324   :  { %v2206_v2 = vadd.f32 %v2448_v24, %v2205_v12  ;;  %v2578_v55 = vpop.f32.mrb[17].mxu1 }
 0x325   :  { %v2208_v51 = vpop.f32.mrb[18].mxu1 }
 0x326   :  { %v2220_v13 = vmax.f32 %v2206_v2, 0.0  ;;  %v2209_v57 = vadd.f32 %v2448_v24, %v2208_v51  ;;  %v2579_v39 = vpop.f32.mrb[19].mxu1 }
 0x328   :  { %v2491_v62 = vpack.c.bf16 %v2220_v13, %v2220_v13  ;;  %v2221_v29 = vmax.f32 %v2209_v57, 0.0 }
 0x32a   :  { %2271 = vst.msk [vmem:[%s3593_s5 + $0x20] sm:$0xf] %vm2262_vm4, %v2491_v62  ;;  %v2492_v47 = vpack.c.bf16 %v2221_v29, %v2221_v29 }
 0x32c   :  { %2272 = vst.msk [vmem:[%s3593_s5 + $0x24] sm:$0xf] %vm2262_vm4, %v2492_v47 }

</bundles_post_ra>
